<compile_context>
chip_gen: v6e
topology: v6e:2x2x1
jax: 0.10.0
libtpu: 0.0.40
codegen_flags: <defaults>
</compile_context>

<pallas_src>
import functools
import math

import jax
import jax.numpy as jnp
from jax import lax
from jax.experimental import pallas as pl
from jax.experimental.pallas import tpu as pltpu

# Large-but-finite so fully-masked rows within a visited tile never produce NaN.
# (With the causal mask and pos >= 0, KV tile 0 always has a valid key, so the
# running max becomes finite on the first visited tile for every row.)
_MASK_VALUE = -1e30


def _vmem_capacity_bytes():
    try:
        return pltpu.get_tpu_info().vmem_capacity_bytes
    except Exception:
        return 128 * 1024 * 1024


def _pick_kv_tile(max_seq, q_rows_total):
    small_vmem = _vmem_capacity_bytes() <= 64 * 1024 * 1024
    if q_rows_total <= 32:                 # decode: long tiles, fewer grid steps
        target = 2048
    else:                                  # prefill
        target = 512 if small_vmem else 1024
    tile = min(target, max_seq)
    while tile > 1 and max_seq % tile:
        tile //= 2
    return max(tile, 1)


def _pick_q_tile(seqlen, n_rep):
    small_vmem = _vmem_capacity_bytes() <= 64 * 1024 * 1024
    target_rows = 256 if small_vmem else 512
    target = max(target_rows // max(n_rep, 1), 8)
    if seqlen <= target:
        return seqlen
    t = (target // 8) * 8
    while t >= 8:
        if seqlen % t == 0:
            return t
        t -= 8
    return seqlen


def _kv_block_spec(kv_tile, head_dim, index_map, buffers):
    """K/V BlockSpec; request a deeper pipeline when asked (decode)."""
    if buffers > 2:
        try:
            return pl.BlockSpec((None, None, kv_tile, head_dim), index_map,
                                pipeline_mode=pl.Buffered(buffers))
        except Exception:
            pass  # pipeline_mode/Buffered unavailable -> default double-buffering
    return pl.BlockSpec((None, None, kv_tile, head_dim), index_map)


def _make_sdpa_kernel(n_rep, q_tile, head_dim, kv_tile, num_kv_tiles, scale):
    q_rows = q_tile * n_rep
    # Pair heads so finalize stores are 128-lane aligned when head_dim < 128.
    if head_dim < 128 and 128 % head_dim == 0 and n_rep % (128 // head_dim) == 0:
        heads_per_store = 128 // head_dim
    else:
        heads_per_store = 1

    def kernel(kv_nt_ref, min_pos_ref,           # SMEM scalar prefetch
               q_ref, k_ref, v_ref, pos_ref,     # VMEM inputs
               o_ref,                            # VMEM output block
               m_ref, l_ref, acc_ref):           # f32 online-softmax scratch
        qt = pl.program_id(2)
        kt = pl.program_id(3)
        needed = kv_nt_ref[qt]                   # causally-needed KV tiles

        @pl.when(kt == 0)
        def _init():
            m_ref[...] = jnp.full_like(m_ref, _MASK_VALUE)
            l_ref[...] = jnp.zeros_like(l_ref)
            acc_ref[...] = jnp.zeros_like(acc_ref)

        def _online_update(s):
            m_prev = m_ref[...]
            m_new = jnp.maximum(m_prev, jnp.max(s, axis=-1, keepdims=True))
            alpha = jnp.exp(m_prev - m_new)
            p = jnp.exp(s - m_new)
            l_ref[...] = alpha * l_ref[...] + jnp.sum(p, axis=-1, keepdims=True)
            acc_ref[...] = alpha * acc_ref[...] + lax.dot_general(
                p.astype(v_ref.dtype), v_ref[...], (((1,), (0,)), ((), ())),
                preferred_element_type=jnp.float32)
            m_ref[...] = m_new

        @pl.when(kt < needed)                    # skip tiles past the causal prefix
        def _compute():
            # Scale folded into q (tiny vs scaling the (rows, kv_tile) scores).
            q = q_ref[...] * jnp.asarray(scale, dtype=q_ref.dtype)
            s = lax.dot_general(q, k_ref[...], (((1,), (1,)), ((), ())),
                                preferred_element_type=jnp.float32)

            # Interior tile: every key position <= min query position -> no mask.
            is_interior = (kt + 1) * kv_tile - 1 <= min_pos_ref[qt]

            @pl.when(is_interior)
            def _unmasked():
                _online_update(s)

            @pl.when(jnp.logical_not(is_interior))
            def _boundary():
                kv_ids = kt * kv_tile + lax.broadcasted_iota(
                    jnp.int32, (q_rows, kv_tile), 1)
                _online_update(jnp.where(kv_ids <= pos_ref[...], s, _MASK_VALUE))

        @pl.when(kt == num_kv_tiles - 1)
        def _finalize():
            inv_l = pl.reciprocal(l_ref[...], approx=True)
            out = (acc_ref[...] * inv_l).astype(o_ref.dtype)   # (q_rows, head_dim)
            # Rows are head-major within the q-tile (row = h*q_tile + qi); write
            # per-head column slices, pairing heads into 128-lane-wide stores.
            for h0 in range(0, n_rep, heads_per_store):        # static, small
                cols = [out[(h0 + j) * q_tile:(h0 + j + 1) * q_tile, :]
                        for j in range(heads_per_store)]
                slab = cols[0] if heads_per_store == 1 else jnp.concatenate(cols, axis=-1)
                o_ref[:, h0 * head_dim:(h0 + heads_per_store) * head_dim] = slab

    return kernel


def sdpa_flex_attention(q_packed, k_cache, v_cache, pos_rows, kv_nt, min_pos,
                        n_rep, q_tile, kv_tile):
    """q_packed: (bsz, n_kv_heads, seqlen*n_rep, head_dim), rows head-major per q-tile
       k_cache/v_cache: (bsz, n_kv_heads, max_seq, head_dim)
       pos_rows: (seqlen*n_rep, 1) int32 query position per packed row
       kv_nt/min_pos: (num_q_tiles,) int32 scalar-prefetch metadata
       returns: (bsz, seqlen, n_kv_heads*n_rep*head_dim)"""
    bsz, n_kv_heads, rows_total, head_dim = q_packed.shape
    _, _, max_seq, _ = k_cache.shape
    seqlen = rows_total // n_rep
    assert rows_total == n_rep * seqlen
    assert seqlen % q_tile == 0 and max_seq % kv_tile == 0
    num_q_tiles = seqlen // q_tile
    num_kv_tiles = max_seq // kv_tile
    q_rows = q_tile * n_rep
    dim_out = n_kv_heads * n_rep * head_dim
    scale = 1.0 / math.sqrt(head_dim)

    # (8,128) BlockSpec constraints.
    assert q_rows % 8 == 0 or q_rows == rows_total
    assert q_tile % 8 == 0 or q_tile == seqlen
    assert kv_tile % 8 == 0 or kv_tile == max_seq
    assert (n_rep * head_dim) % 128 == 0 or n_kv_heads == 1, \
        "output block lane width must be 128-aligned (or n_kv_heads == 1)"

    kernel = _make_sdpa_kernel(n_rep, q_tile, head_dim, kv_tile, num_kv_tiles, scale)

    grid = (bsz, n_kv_heads, num_q_tiles, num_kv_tiles)

    def q_index(b, g, qt, kt, kv_nt_ref, min_pos_ref):
        return (b, g, qt, 0)

    def kv_index(b, g, qt, kt, kv_nt_ref, min_pos_ref):
        # Clamp to the last needed tile so skipped steps keep the same block
        # index and Pallas elides the HBM->VMEM DMA entirely.
        return (b, g, jnp.minimum(kt, kv_nt_ref[qt] - 1), 0)

    def pos_index(b, g, qt, kt, kv_nt_ref, min_pos_ref):
        return (qt, 0)

    def o_index(b, g, qt, kt, kv_nt_ref, min_pos_ref):
        return (b, qt, g)

    deep_kv = 3 if rows_total <= 64 else 2   # decode: hide exposed DMA latency
    q_spec = pl.BlockSpec((None, None, q_rows, head_dim), q_index)
    k_spec = _kv_block_spec(kv_tile, head_dim, kv_index, deep_kv)
    v_spec = _kv_block_spec(kv_tile, head_dim, kv_index, deep_kv)
    pos_spec = pl.BlockSpec((q_rows, 1), pos_index)
    o_spec = pl.BlockSpec((None, q_tile, n_rep * head_dim), o_index)

    # VMEM estimate (accounts for 128-lane padding of head_dim-minor blocks).
    lane = 128
    hd_pad = -(-head_dim // lane) * lane
    kv_itm = k_cache.dtype.itemsize
    q_itm = q_packed.dtype.itemsize
    est = (2 * deep_kv * kv_tile * hd_pad * kv_itm            # K + V streams
           + 2 * q_rows * hd_pad * q_itm                      # Q (double-buffered)
           + 2 * q_rows * lane * 4                            # pos block (padded)
           + 2 * q_tile * max(n_rep * head_dim, lane) * q_itm # output block
           + q_rows * (hd_pad + 2 * lane) * 4                 # acc, m, l scratch
           + 3 * q_rows * kv_tile * 4)                        # s / p temporaries
    vmem_cap = _vmem_capacity_bytes()
    ceiling = (40 if vmem_cap <= 64 * 1024 * 1024 else 64) * 1024 * 1024
    vmem_limit = int(min(max(2 * est, 16 * 1024 * 1024), ceiling))

    # NOTE: upper bound — causal tile skipping reads only the valid KV prefix,
    # which is not known at trace time.
    cost = pl.CostEstimate(
        flops=4 * bsz * n_kv_heads * rows_total * max_seq * head_dim,
        transcendentals=bsz * n_kv_heads * rows_total * max_seq,
        bytes_accessed=(q_packed.size * q_itm
                        + k_cache.size * kv_itm + v_cache.size * kv_itm
                        + bsz * seqlen * dim_out * q_itm),
    )

    return pl.pallas_call(
        kernel,
        out_shape=jax.ShapeDtypeStruct((bsz, seqlen, dim_out), q_packed.dtype),
        grid_spec=pltpu.PrefetchScalarGridSpec(
            num_scalar_prefetch=2,
            grid=grid,
            in_specs=[q_spec, k_spec, v_spec, pos_spec],
            out_specs=o_spec,
            scratch_shapes=[
                pltpu.VMEM((q_rows, 1), jnp.float32),          # m
                pltpu.VMEM((q_rows, 1), jnp.float32),          # l
                pltpu.VMEM((q_rows, head_dim), jnp.float32),   # acc
            ],
        ),
        compiler_params=pltpu.CompilerParams(
            dimension_semantics=("parallel", "parallel", "parallel", "arbitrary"),
            vmem_limit_bytes=vmem_limit,
        ),
        cost_estimate=cost,
    )(kv_nt, min_pos, q_packed, k_cache, v_cache, pos_rows)


@functools.partial(jax.jit,
                   static_argnames=("n_rep", "dim", "kv_tile", "q_tile"),
                   donate_argnames=("k_cache", "v_cache"))
def sdpa_flex_forward(input_pos, q, k, v, *, k_cache, v_cache, n_rep, dim,
                      kv_tile=None, q_tile=None):
    """Mirrors SDPAFlex.forward (causal mask[input_pos] semantics).

    input_pos: (seqlen,) int32;  q: (bsz, seqlen, n_heads, head_dim)
    k, v: (bsz, n_kv_heads, seqlen, head_dim)
    k_cache/v_cache: (bsz, n_kv_heads, max_seq, head_dim)  (donated)
    returns: (bsz, seqlen, dim), updated k_cache, v_cache
    """
    bsz, seqlen, n_heads, head_dim = q.shape
    n_kv_heads = n_heads // n_rep
    assert n_heads == n_kv_heads * n_rep and dim == n_heads * head_dim
    max_seq = k_cache.shape[2]
    rows_total = seqlen * n_rep
    if kv_tile is None:
        kv_tile = _pick_kv_tile(max_seq, rows_total)
    if q_tile is None:
        q_tile = _pick_q_tile(seqlen, n_rep)
    num_kv_tiles = max_seq // kv_tile
    num_q_tiles = seqlen // q_tile
    q_rows = q_tile * n_rep

    # KV-cache update at input_pos (donated buffers -> in-place scatter).
    # TODO(synk): fold the scatter into the kernel via input_output_aliases to
    # save one HBM round trip per decode step.
    k_cache = k_cache.at[:, :, input_pos, :].set(k.astype(k_cache.dtype))
    v_cache = v_cache.at[:, :, input_pos, :].set(v.astype(v_cache.dtype))

    # GQA packing, head-major within each q-tile: packed row = qt*q_rows +
    # h_local*q_tile + qi_local. Each K/V tile is DMA'd once per kv-head and
    # the finalize writes contiguous per-head column slices.
    q6 = q.reshape(bsz, num_q_tiles, q_tile, n_kv_heads, n_rep, head_dim)
    q_packed = jnp.transpose(q6, (0, 3, 1, 4, 2, 5)).reshape(
        bsz, n_kv_heads, rows_total, head_dim)

    pos_i32 = input_pos.astype(jnp.int32)
    pos_tiles = pos_i32.reshape(num_q_tiles, q_tile)
    pos_rows = jnp.broadcast_to(pos_tiles[:, None, :],
                                (num_q_tiles, n_rep, q_tile)).reshape(rows_total, 1)

    # Per-q-tile scalar-prefetch metadata: causally-needed KV tile count
    # (DMA + compute skipping) and min query position (mask boundary tiles only).
    max_pos = jnp.max(pos_tiles, axis=1)
    min_pos = jnp.min(pos_tiles, axis=1).astype(jnp.int32)
    kv_nt = jnp.clip(max_pos // kv_tile + 1, 1, num_kv_tiles).astype(jnp.int32)

    y = sdpa_flex_attention(q_packed, k_cache, v_cache, pos_rows, kv_nt, min_pos,
                            n_rep, q_tile, kv_tile)
    # y is already (bsz, seqlen, dim): no wrapper transpose/reshape needed.
    return y, k_cache, v_cache


if __name__ == "__main__":
    key = jax.random.PRNGKey(0)

    bsz = 2
    n_heads = 4
    n_kv_heads = 2
    n_rep = n_heads // n_kv_heads
    head_dim = 64
    dim = n_heads * head_dim
    max_seq = 256
    kv_tile = 128          # 2 KV tiles: exercises tile skipping + boundary masking

    dtype = jnp.bfloat16   # native bf16 MXU inputs, f32 accumulation
    k_cache = jnp.zeros((bsz, n_kv_heads, max_seq, head_dim), dtype=dtype)
    v_cache = jnp.zeros((bsz, n_kv_heads, max_seq, head_dim), dtype=dtype)

    def reference(q, k_cache, v_cache, input_pos):
        qf = q.astype(jnp.float32)
        kcf = k_cache.astype(jnp.float32)
        vcf = v_cache.astype(jnp.float32)
        mask = jnp.where(jnp.tril(jnp.ones((max_seq, max_seq), dtype=bool)),
                         0.0, float("-inf")).astype(jnp.float32)
        q_bhsd = jnp.transpose(qf, (0, 2, 1, 3))
        k_rep = jnp.repeat(kcf, n_rep, axis=1)
        v_rep = jnp.repeat(vcf, n_rep, axis=1)
        s = q_bhsd @ jnp.swapaxes(k_rep, -2, -1) / math.sqrt(head_dim) + mask[input_pos]
        p = jax.nn.softmax(s, axis=-1)
        return (p @ v_rep).transpose(0, 2, 1, 3).reshape(q.shape[0], q.shape[1], dim)

    def run_step(step_key, seqlen, start_pos, k_cache, v_cache, q_tile=None):
        kq, kk, kv = jax.random.split(step_key, 3)
        q = jax.random.normal(kq, (bsz, seqlen, n_heads, head_dim), jnp.float32).astype(dtype)
        k = jax.random.normal(kk, (bsz, n_kv_heads, seqlen, head_dim), jnp.float32).astype(dtype)
        v = jax.random.normal(kv, (bsz, n_kv_heads, seqlen, head_dim), jnp.float32).astype(dtype)
        input_pos = start_pos + jnp.arange(seqlen, dtype=jnp.int32)
        y, k_cache, v_cache = sdpa_flex_forward(
            input_pos, q, k, v, k_cache=k_cache, v_cache=v_cache,
            n_rep=n_rep, dim=dim, kv_tile=kv_tile, q_tile=q_tile)
        y = jax.block_until_ready(y)
        assert y.shape == (bsz, seqlen, dim)
        y_ref = reference(q, k_cache, v_cache, input_pos)
        err = float(jnp.max(jnp.abs(y.astype(jnp.float32) - y_ref)))
        assert jnp.allclose(y.astype(jnp.float32), y_ref, atol=5e-2, rtol=5e-2), \
            f"mismatch vs reference (max abs err {err})"
        return k_cache, v_cache

    key1, key2 = jax.random.split(key)
    # Prefill at positions [0, 128): two q-tiles; causal tile skipping elides KV tile 1.
    k_cache, v_cache = run_step(key1, 128, 0, k_cache, v_cache, q_tile=64)
    # Decode-style step at positions [128, 136): interior (unmasked) KV tile 0 +
    # masked boundary KV tile 1; small q-row block takes the deep K/V pipeline path.
    k_cache, v_cache = run_step(key2, 8, 128, k_cache, v_cache)

    print("KERNEL_OK")
</pallas_src>

<mosaic_0001>
module attributes {stable_mosaic.version = 11 : i64} {
  func.func @kernel(%arg0: i32, %arg1: i32, %arg2: i32, %arg3: i32, %arg4: memref<2xi32, #tpu.memory_space<smem>>, %arg5: memref<2xi32, #tpu.memory_space<smem>>, %arg6: memref<1x1x128x64xbf16, #tpu.memory_space<vmem>>, %arg7: memref<1x1x128x64xbf16, #tpu.memory_space<vmem>>, %arg8: memref<1x1x128x64xbf16, #tpu.memory_space<vmem>>, %arg9: memref<128x1xi32, #tpu.memory_space<vmem>>, %arg10: memref<1x64x128xbf16, #tpu.memory_space<vmem>>, %arg11: memref<128x1xf32, #tpu.memory_space<vmem>>, %arg12: memref<128x1xf32, #tpu.memory_space<vmem>>, %arg13: memref<128x64xf32, #tpu.memory_space<vmem>>) attributes {dimension_semantics = [#tpu.dimension_semantics<parallel>, #tpu.dimension_semantics<parallel>, #tpu.dimension_semantics<parallel>, #tpu.dimension_semantics<arbitrary>], iteration_bounds = array<i64: 2, 2, 2, 2>, scalar_prefetch = 2 : i64, scratch_operands = 3 : i64, tpu.core_type = #tpu.core_type<tc>, window_params = [{transform_indices = @transform_0, window_bounds = array<i64: 1, 1, 128, 64>}, {transform_indices = @transform_1, window_bounds = array<i64: 1, 1, 128, 64>}, {transform_indices = @transform_2, window_bounds = array<i64: 1, 1, 128, 64>}, {transform_indices = @transform_3, window_bounds = array<i64: 128, 1>}, {transform_indices = @transform_4, window_bounds = array<i64: 1, 64, 128>}]} {
    %0 = arith.index_cast %arg2 : i32 to index
    %1 = memref.load %arg4[%0] : memref<2xi32, #tpu.memory_space<smem>>
    %c0_i32 = arith.constant 0 : i32
    %2 = arith.cmpi eq, %arg3, %c0_i32 : i32
    %3 = arith.extui %2 : i1 to i32
    %c0_i32_0 = arith.constant 0 : i32
    %4 = arith.cmpi ne, %3, %c0_i32_0 : i32
    scf.if %4 {
      %cst = arith.constant -1.000000e+30 : f32
      %11 = vector.broadcast %cst : f32 to vector<128x1xf32>
      %c0 = arith.constant 0 : index
      %c0_3 = arith.constant 0 : index
      %12 = vector.load %arg11[%c0, %c0_3] : memref<128x1xf32, #tpu.memory_space<vmem>>, vector<128x1xf32>
      tpu.vector_store %arg11[%c0, %c0_3], %11 {strides = array<i32>} : memref<128x1xf32, #tpu.memory_space<vmem>>, vector<128x1xf32>,
      %cst_4 = arith.constant 0.000000e+00 : f32
      %13 = vector.broadcast %cst_4 : f32 to vector<128x1xf32>
      %c0_5 = arith.constant 0 : index
      %c0_6 = arith.constant 0 : index
      %14 = vector.load %arg12[%c0_5, %c0_6] : memref<128x1xf32, #tpu.memory_space<vmem>>, vector<128x1xf32>
      tpu.vector_store %arg12[%c0_5, %c0_6], %13 {strides = array<i32>} : memref<128x1xf32, #tpu.memory_space<vmem>>, vector<128x1xf32>,
      %cst_7 = arith.constant 0.000000e+00 : f32
      %15 = vector.broadcast %cst_7 : f32 to vector<128x64xf32>
      %c0_8 = arith.constant 0 : index
      %c0_9 = arith.constant 0 : index
      %16 = vector.load %arg13[%c0_8, %c0_9] : memref<128x64xf32, #tpu.memory_space<vmem>>, vector<128x64xf32>
      tpu.vector_store %arg13[%c0_8, %c0_9], %15 {strides = array<i32>} : memref<128x64xf32, #tpu.memory_space<vmem>>, vector<128x64xf32>,
    } else {
    }
    %5 = arith.cmpi slt, %arg3, %1 : i32
    %6 = arith.extui %5 : i1 to i32
    %c0_i32_1 = arith.constant 0 : i32
    %7 = arith.cmpi ne, %6, %c0_i32_1 : i32
    scf.if %7 {
      %c0 = arith.constant 0 : index
      %c0_3 = arith.constant 0 : index
      %c0_4 = arith.constant 0 : index
      %c0_5 = arith.constant 0 : index
      %11 = vector.load %arg6[%c0, %c0_3, %c0_4, %c0_5] : memref<1x1x128x64xbf16, #tpu.memory_space<vmem>>, vector<1x1x128x64xbf16>
      %12 = vector.shape_cast %11 : vector<1x1x128x64xbf16> to vector<128x64xbf16>
      %cst = arith.constant 1.250000e-01 : bf16
      %13 = vector.broadcast %cst : bf16 to vector<128x64xbf16>
      %14 = arith.mulf %12, %13 : vector<128x64xbf16>
      %c0_6 = arith.constant 0 : index
      %c0_7 = arith.constant 0 : index
      %c0_8 = arith.constant 0 : index
      %c0_9 = arith.constant 0 : index
      %15 = vector.load %arg7[%c0_6, %c0_7, %c0_8, %c0_9] : memref<1x1x128x64xbf16, #tpu.memory_space<vmem>>, vector<1x1x128x64xbf16>
      %16 = vector.shape_cast %15 : vector<1x1x128x64xbf16> to vector<128x64xbf16>
      %cst_10 = arith.constant dense<0.000000e+00> : vector<128x128xf32>
      %17 = tpu.matmul %14, %16, %cst_10 {dimension_numbers = #tpu.dot_dimension_numbers<[1], [1], [0], [0], [0, 0, 1, 0], [], []>} : vector<128x64xbf16>, vector<128x64xbf16>, vector<128x128xf32> -> vector<128x128xf32>
      %c1_i32_11 = arith.constant 1 : i32
      %18 = arith.addi %arg3, %c1_i32_11 : i32
      %c128_i32 = arith.constant 128 : i32
      %19 = arith.muli %18, %c128_i32 : i32
      %c1_i32_12 = arith.constant 1 : i32
      %20 = arith.subi %19, %c1_i32_12 : i32
      %21 = arith.index_cast %arg2 : i32 to index
      %22 = memref.load %arg5[%21] : memref<2xi32, #tpu.memory_space<smem>>
      %23 = arith.cmpi sle, %20, %22 : i32
      %24 = arith.extui %23 : i1 to i32
      %c0_i32_13 = arith.constant 0 : i32
      %25 = arith.cmpi ne, %24, %c0_i32_13 : i32
      scf.if %25 {
        %c0_15 = arith.constant 0 : index
        %c0_16 = arith.constant 0 : index
        %29 = vector.load %arg11[%c0_15, %c0_16] : memref<128x1xf32, #tpu.memory_space<vmem>>, vector<128x1xf32>
        %cst_17 = arith.constant dense<0xFF800000> : vector<128xf32>
        %30 = vector.multi_reduction <maximumf>, %17, %cst_17 [1] : vector<128x128xf32> to vector<128xf32>
        %31 = vector.shape_cast %30 : vector<128xf32> to vector<128x1xf32>
        %32 = arith.maximumf %29, %31 : vector<128x1xf32>
        %33 = arith.subf %29, %32 : vector<128x1xf32>
        %34 = math.exp %33 : vector<128x1xf32>
        %35 = vector.broadcast %32 : vector<128x1xf32> to vector<128x128xf32>
        %36 = arith.subf %17, %35 : vector<128x128xf32>
        %37 = math.exp %36 : vector<128x128xf32>
        %c0_18 = arith.constant 0 : index
        %c0_19 = arith.constant 0 : index
        %38 = vector.load %arg12[%c0_18, %c0_19] : memref<128x1xf32, #tpu.memory_space<vmem>>, vector<128x1xf32>
        %39 = arith.mulf %34, %38 : vector<128x1xf32>
        %cst_20 = arith.constant dense<0.000000e+00> : vector<128xf32>
        %40 = vector.multi_reduction <add>, %37, %cst_20 [1] : vector<128x128xf32> to vector<128xf32>
        %41 = vector.shape_cast %40 : vector<128xf32> to vector<128x1xf32>
        %42 = arith.addf %39, %41 : vector<128x1xf32>
        %c0_21 = arith.constant 0 : index
        %c0_22 = arith.constant 0 : index
        %43 = vector.load %arg12[%c0_21, %c0_22] : memref<128x1xf32, #tpu.memory_space<vmem>>, vector<128x1xf32>
        tpu.vector_store %arg12[%c0_21, %c0_22], %42 {strides = array<i32>} : memref<128x1xf32, #tpu.memory_space<vmem>>, vector<128x1xf32>,
        %c0_23 = arith.constant 0 : index
        %c0_24 = arith.constant 0 : index
        %44 = vector.load %arg13[%c0_23, %c0_24] : memref<128x64xf32, #tpu.memory_space<vmem>>, vector<128x64xf32>
        %45 = vector.broadcast %34 : vector<128x1xf32> to vector<128x64xf32>
        %46 = arith.mulf %45, %44 : vector<128x64xf32>
        %47 = arith.truncf %37 : vector<128x128xf32> to vector<128x128xbf16>
        %c0_25 = arith.constant 0 : index
        %c0_26 = arith.constant 0 : index
        %c0_27 = arith.constant 0 : index
        %c0_28 = arith.constant 0 : index
        %48 = vector.load %arg8[%c0_25, %c0_26, %c0_27, %c0_28] : memref<1x1x128x64xbf16, #tpu.memory_space<vmem>>, vector<1x1x128x64xbf16>
        %49 = vector.shape_cast %48 : vector<1x1x128x64xbf16> to vector<128x64xbf16>
        %cst_29 = arith.constant dense<0.000000e+00> : vector<128x64xf32>
        %50 = tpu.matmul %47, %49, %cst_29 {dimension_numbers = #tpu.dot_dimension_numbers<[1], [0], [0], [1], [0, 0, 1, 1], [], []>} : vector<128x128xbf16>, vector<128x64xbf16>, vector<128x64xf32> -> vector<128x64xf32>
        %51 = arith.addf %46, %50 : vector<128x64xf32>
        %c0_30 = arith.constant 0 : index
        %c0_31 = arith.constant 0 : index
        %52 = vector.load %arg13[%c0_30, %c0_31] : memref<128x64xf32, #tpu.memory_space<vmem>>, vector<128x64xf32>
        tpu.vector_store %arg13[%c0_30, %c0_31], %51 {strides = array<i32>} : memref<128x64xf32, #tpu.memory_space<vmem>>, vector<128x64xf32>,
        %c0_32 = arith.constant 0 : index
        %c0_33 = arith.constant 0 : index
        %53 = vector.load %arg11[%c0_32, %c0_33] : memref<128x1xf32, #tpu.memory_space<vmem>>, vector<128x1xf32>
        tpu.vector_store %arg11[%c0_32, %c0_33], %32 {strides = array<i32>} : memref<128x1xf32, #tpu.memory_space<vmem>>, vector<128x1xf32>,
      } else {
      }
      %true = arith.constant true
      %26 = arith.xori %23, %true : i1
      %27 = arith.extui %26 : i1 to i32
      %c0_i32_14 = arith.constant 0 : i32
      %28 = arith.cmpi ne, %27, %c0_i32_14 : i32
      scf.if %28 {
        %c128_i32_15 = arith.constant 128 : i32
        %29 = arith.muli %arg3, %c128_i32_15 : i32
        %30 = tpu.iota {dimensions = array<i32: 1>} : vector<128x128xi32>
        %31 = vector.broadcast %29 : i32 to vector<128x128xi32>
        %32 = arith.addi %31, %30 : vector<128x128xi32>
        %c0_16 = arith.constant 0 : index
        %c0_17 = arith.constant 0 : index
        %33 = vector.load %arg9[%c0_16, %c0_17] : memref<128x1xi32, #tpu.memory_space<vmem>>, vector<128x1xi32>
        %34 = vector.broadcast %33 : vector<128x1xi32> to vector<128x128xi32>
        %35 = arith.cmpi sle, %32, %34 : vector<128x128xi32>
        %cst_18 = arith.constant -1.000000e+30 : f32
        %36 = vector.broadcast %cst_18 : f32 to vector<128x128xf32>
        %37 = arith.select %35, %17, %36 : vector<128x128xi1>, vector<128x128xf32>
        %c0_19 = arith.constant 0 : index
        %c0_20 = arith.constant 0 : index
        %38 = vector.load %arg11[%c0_19, %c0_20] : memref<128x1xf32, #tpu.memory_space<vmem>>, vector<128x1xf32>
        %cst_21 = arith.constant dense<0xFF800000> : vector<128xf32>
        %39 = vector.multi_reduction <maximumf>, %37, %cst_21 [1] : vector<128x128xf32> to vector<128xf32>
        %40 = vector.shape_cast %39 : vector<128xf32> to vector<128x1xf32>
        %41 = arith.maximumf %38, %40 : vector<128x1xf32>
        %42 = arith.subf %38, %41 : vector<128x1xf32>
        %43 = math.exp %42 : vector<128x1xf32>
        %44 = vector.broadcast %41 : vector<128x1xf32> to vector<128x128xf32>
        %45 = arith.subf %37, %44 : vector<128x128xf32>
        %46 = math.exp %45 : vector<128x128xf32>
        %c0_22 = arith.constant 0 : index
        %c0_23 = arith.constant 0 : index
        %47 = vector.load %arg12[%c0_22, %c0_23] : memref<128x1xf32, #tpu.memory_space<vmem>>, vector<128x1xf32>
        %48 = arith.mulf %43, %47 : vector<128x1xf32>
        %cst_24 = arith.constant dense<0.000000e+00> : vector<128xf32>
        %49 = vector.multi_reduction <add>, %46, %cst_24 [1] : vector<128x128xf32> to vector<128xf32>
        %50 = vector.shape_cast %49 : vector<128xf32> to vector<128x1xf32>
        %51 = arith.addf %48, %50 : vector<128x1xf32>
        %c0_25 = arith.constant 0 : index
        %c0_26 = arith.constant 0 : index
        %52 = vector.load %arg12[%c0_25, %c0_26] : memref<128x1xf32, #tpu.memory_space<vmem>>, vector<128x1xf32>
        tpu.vector_store %arg12[%c0_25, %c0_26], %51 {strides = array<i32>} : memref<128x1xf32, #tpu.memory_space<vmem>>, vector<128x1xf32>,
        %c0_27 = arith.constant 0 : index
        %c0_28 = arith.constant 0 : index
        %53 = vector.load %arg13[%c0_27, %c0_28] : memref<128x64xf32, #tpu.memory_space<vmem>>, vector<128x64xf32>
        %54 = vector.broadcast %43 : vector<128x1xf32> to vector<128x64xf32>
        %55 = arith.mulf %54, %53 : vector<128x64xf32>
        %56 = arith.truncf %46 : vector<128x128xf32> to vector<128x128xbf16>
        %c0_29 = arith.constant 0 : index
        %c0_30 = arith.constant 0 : index
        %c0_31 = arith.constant 0 : index
        %c0_32 = arith.constant 0 : index
        %57 = vector.load %arg8[%c0_29, %c0_30, %c0_31, %c0_32] : memref<1x1x128x64xbf16, #tpu.memory_space<vmem>>, vector<1x1x128x64xbf16>
        %58 = vector.shape_cast %57 : vector<1x1x128x64xbf16> to vector<128x64xbf16>
        %cst_33 = arith.constant dense<0.000000e+00> : vector<128x64xf32>
        %59 = tpu.matmul %56, %58, %cst_33 {dimension_numbers = #tpu.dot_dimension_numbers<[1], [0], [0], [1], [0, 0, 1, 1], [], []>} : vector<128x128xbf16>, vector<128x64xbf16>, vector<128x64xf32> -> vector<128x64xf32>
        %60 = arith.addf %55, %59 : vector<128x64xf32>
        %c0_34 = arith.constant 0 : index
        %c0_35 = arith.constant 0 : index
        %61 = vector.load %arg13[%c0_34, %c0_35] : memref<128x64xf32, #tpu.memory_space<vmem>>, vector<128x64xf32>
        tpu.vector_store %arg13[%c0_34, %c0_35], %60 {strides = array<i32>} : memref<128x64xf32, #tpu.memory_space<vmem>>, vector<128x64xf32>,
        %c0_36 = arith.constant 0 : index
        %c0_37 = arith.constant 0 : index
        %62 = vector.load %arg11[%c0_36, %c0_37] : memref<128x1xf32, #tpu.memory_space<vmem>>, vector<128x1xf32>
        tpu.vector_store %arg11[%c0_36, %c0_37], %41 {strides = array<i32>} : memref<128x1xf32, #tpu.memory_space<vmem>>, vector<128x1xf32>,
      } else {
      }
    } else {
    }
    %c1_i32 = arith.constant 1 : i32
    %8 = arith.cmpi eq, %arg3, %c1_i32 : i32
    %9 = arith.extui %8 : i1 to i32
    %c0_i32_2 = arith.constant 0 : i32
    %10 = arith.cmpi ne, %9, %c0_i32_2 : i32
    scf.if %10 {
      %c0 = arith.constant 0 : index
      %c0_3 = arith.constant 0 : index
      %11 = vector.load %arg12[%c0, %c0_3] : memref<128x1xf32, #tpu.memory_space<vmem>>, vector<128x1xf32>
      %12 = tpu.reciprocal %11 {approx = true} : vector<128x1xf32> -> vector<128x1xf32>
      %c0_4 = arith.constant 0 : index
      %c0_5 = arith.constant 0 : index
      %13 = vector.load %arg13[%c0_4, %c0_5] : memref<128x64xf32, #tpu.memory_space<vmem>>, vector<128x64xf32>
      %14 = vector.broadcast %12 : vector<128x1xf32> to vector<128x64xf32>
      %15 = arith.mulf %13, %14 : vector<128x64xf32>
      %16 = arith.truncf %15 : vector<128x64xf32> to vector<128x64xbf16>
      %17 = vector.extract_strided_slice %16 {offsets = [0, 0], sizes = [64, 64], strides = [1, 1]} : vector<128x64xbf16> to vector<64x64xbf16>
      %18 = vector.extract_strided_slice %16 {offsets = [64, 0], sizes = [64, 64], strides = [1, 1]} : vector<128x64xbf16> to vector<64x64xbf16>
      %19 = tpu.concatenate %17, %18 in 1 : vector<64x64xbf16>, vector<64x64xbf16> -> vector<64x128xbf16>
      %c0_6 = arith.constant 0 : index
      %c0_7 = arith.constant 0 : index
      %c0_8 = arith.constant 0 : index
      %20 = vector.load %arg10[%c0_6, %c0_7, %c0_8] : memref<1x64x128xbf16, #tpu.memory_space<vmem>>, vector<1x64x128xbf16>
      %21 = vector.shape_cast %20 : vector<1x64x128xbf16> to vector<64x128xbf16>
      %22 = vector.shape_cast %19 : vector<64x128xbf16> to vector<1x64x128xbf16>
      tpu.vector_store %arg10[%c0_6, %c0_7, %c0_8], %22 {strides = array<i32>} : memref<1x64x128xbf16, #tpu.memory_space<vmem>>, vector<1x64x128xbf16>,
    } else {
    }
    return
  }
  func.func @transform_0(%arg0: i32, %arg1: i32, %arg2: i32, %arg3: i32, %arg4: memref<2xi32, #tpu.memory_space<smem>>, %arg5: memref<2xi32, #tpu.memory_space<smem>>) -> (i32, i32, i32, i32) {
    %c0_i32 = arith.constant 0 : i32
    %c0_i32_0 = arith.constant 0 : i32
    return %arg0, %arg1, %arg2, %c0_i32 : i32, i32, i32, i32
  }
  func.func @transform_1(%arg0: i32, %arg1: i32, %arg2: i32, %arg3: i32, %arg4: memref<2xi32, #tpu.memory_space<smem>>, %arg5: memref<2xi32, #tpu.memory_space<smem>>) -> (i32, i32, i32, i32) {
    %0 = arith.index_cast %arg2 : i32 to index
    %1 = memref.load %arg4[%0] : memref<2xi32, #tpu.memory_space<smem>>
    %c1_i32 = arith.constant 1 : i32
    %2 = arith.subi %1, %c1_i32 : i32
    %3 = arith.minsi %arg3, %2 : i32
    %c0_i32 = arith.constant 0 : i32
    %c0_i32_0 = arith.constant 0 : i32
    return %arg0, %arg1, %3, %c0_i32 : i32, i32, i32, i32
  }
  func.func @transform_2(%arg0: i32, %arg1: i32, %arg2: i32, %arg3: i32, %arg4: memref<2xi32, #tpu.memory_space<smem>>, %arg5: memref<2xi32, #tpu.memory_space<smem>>) -> (i32, i32, i32, i32) {
    %0 = arith.index_cast %arg2 : i32 to index
    %1 = memref.load %arg4[%0] : memref<2xi32, #tpu.memory_space<smem>>
    %c1_i32 = arith.constant 1 : i32
    %2 = arith.subi %1, %c1_i32 : i32
    %3 = arith.minsi %arg3, %2 : i32
    %c0_i32 = arith.constant 0 : i32
    %c0_i32_0 = arith.constant 0 : i32
    return %arg0, %arg1, %3, %c0_i32 : i32, i32, i32, i32
  }
  func.func @transform_3(%arg0: i32, %arg1: i32, %arg2: i32, %arg3: i32, %arg4: memref<2xi32, #tpu.memory_space<smem>>, %arg5: memref<2xi32, #tpu.memory_space<smem>>) -> (i32, i32) {
    %c0_i32 = arith.constant 0 : i32
    %c0_i32_0 = arith.constant 0 : i32
    return %arg2, %c0_i32 : i32, i32
  }
  func.func @transform_4(%arg0: i32, %arg1: i32, %arg2: i32, %arg3: i32, %arg4: memref<2xi32, #tpu.memory_space<smem>>, %arg5: memref<2xi32, #tpu.memory_space<smem>>) -> (i32, i32, i32) {
    %c0_i32 = arith.constant 0 : i32
    return %arg0, %arg2, %arg1 : i32, i32, i32
  }
}

</mosaic_0001>

<bundles_post_ra>
// kernel: sdpa_flex_forward.1
= control target key start
LH: loop header
LB: loop body
LE: loop exit
PB: predicated region body
PF: predicated region fallthrough
CT: control target
= control target key end

     0   :  { %s4531_s0 = inlined_call_operand.vmem [shape: s32[2], index: 0, kind: input, shape index: {}]   ;;  %s4532_s2 = inlined_call_operand.vmem [shape: bf16[2,2,256,64], index: 2, kind: input, shape index: {}]   ;;  %s4533_s3 = inlined_call_operand.vmem [shape: bf16[2,2,256,64], index: 3, kind: input, shape index: {}]   ;;  %s4534_s4 = inlined_call_operand.vmem [shape: bf16[2,2,256,64], index: 4, kind: input, shape index: {}]   ;;  %s4535_s5 = inlined_call_operand.vmem [shape: s32[256,1], index: 5, kind: input, shape index: {}]   ;;  %s4536_s6 = inlined_call_operand.hbm [shape: bf16[2,128,256], index: 6, kind: output, shape index: {}]   ;;  %s4537_s1 = inlined_call_operand.vmem [shape: s32[2], index: 1, kind: input, shape index: {}]  }
   0x1   :  { %4552 = sst [smem:[#allocation25_spill]] %s4532_s2  ;;  %s11_s23 = sshll.u32 %s4531_s0, 4  ;;  %s12_s23 = int_to_ptr.vmem [resolvable:$true] %s11_s23 }
   0x2   :  { %4553 = sst [smem:[#allocation26_spill]] %s4535_s5  ;;  %s15_s26 = sshll.u32 %s4537_s1, 4  ;;  %s16_s26 = int_to_ptr.vmem [resolvable:$true] %s15_s26 }
   0x3   :  { %4554 = sst [smem:[#allocation27_spill]] %s4536_s6  ;;  %s3227_s27 = scalar_lea.vmem %s12_s23, 16 }
   0x4   :  { %p3228_p0 = scmp.ne.s32.totalorder %s12_s23, %s3227_s27  ;;  %p3232_p1 = scmp.lt.s32.totalorder %s12_s23, %s12_s23 }
   0x5   :  { %p3233_p2 = scmp.lt.s32.totalorder %s3227_s27, %s3227_s27 }
   0x7   :  { %p3234_p3 = por %p3233_p2, %p3232_p1 }
   0x9   :  { %p3235_p4 = pnand %p3234_p3, %p3228_p0 }
   0xb   :  { %3238 = shalt.err (!%p3235_p4)  }
   0xc   :  { %s3379_s28 = smov [#allocation6]   ;;  %s3239_s29 = scalar_lea.vmem %s16_s26, 16 }
   0xd   :  { %14 = dma.vmem_to_smem %s12_s23, 16, %s3379_s28, [#allocation5] }
   0xe   :  { %p3240_p5 = scmp.ne.s32.totalorder %s16_s26, %s3239_s29  ;;  %p3244_p6 = scmp.lt.s32.totalorder %s16_s26, %s16_s26 }
   0xf   :  { %p3245_p7 = scmp.lt.s32.totalorder %s3239_s29, %s3239_s29 }
  0x11   :  { %p3246_p8 = por %p3245_p7, %p3244_p6 }
  0x13   :  { %p3247_p9 = pnand %p3246_p8, %p3240_p5 }
  0x15   :  { %3250 = shalt.err (!%p3247_p9)  }
  0x16   :  { %s3380_s0 = smov [#allocation7]  }
  0x17   :  { %18 = dma.vmem_to_smem %s16_s26, 16, %s3380_s0, [#allocation5] }
  0x18   :  { %3325 = dma.done.wait [#allocation5], 32 }
  0x19   :  { %3326 = vsyncadd [#allocation5], 4294967264 }
  0x1a   :  { %20 = sfence }
  0x1b   :  { %21 = vsyncpa [#allocation9], 0 }
  0x1c   :  { %23 = vsyncpa [#allocation9 + $0x1], 0  ;;  %s3432_s1 = smov 0   ;;  %s3434_s30 = smov 0  }
  0x1d   :  { %s3436_s7 = smov 0   ;;  %s3438_s8 = smov 0  }
  0x1e   :  { %s3440_s9 = smov 0   ;;  %s3442_s10 = smov 0  }
  0x1f   :  { %s3444_s11 = smov 0   ;;  %s3446_s12 = smov 0  }
  0x20   :  { %s3448_s13 = smov 0   ;;  %s3450_s14 = smov 0  }
  0x21   :  { %s3452_s15 = smov 0   ;;  %s3454_s16 = smov 0  }
  0x22 LB: > { %4555 = sst [smem:[#allocation12_spill]] %s3333_s1  ;;  %s2623_s17 = sadd.s32 4294967295, %s3377_s16   ;;  %s3377_s16 = sphi %s3454_s16, %s29_s16   ;;  %s3373_s15 = sphi %s3452_s15, %s4587_s15   ;;  %s3369_s14 = sphi %s3450_s14, %s4586_s14   ;;  %s3365_s13 = sphi %s3448_s13, %s4585_s13   ;;  %s3361_s12 = sphi %s3446_s12, %s4584_s12   ;;  %s3357_s11 = sphi %s3444_s11, %s4583_s11   ;;  %s3353_s10 = sphi %s3442_s10, %s4582_s10   ;;  %s3349_s9 = sphi %s3440_s9, %s4581_s9   ;;  %s3345_s8 = sphi %s3438_s8, %s4580_s8   ;;  %s3341_s7 = sphi %s3436_s7, %s4579_s7   ;;  %s3337_s30 = sphi %s3434_s30, %s4589_s30   ;;  %s3333_s1 = sphi %s3432_s1, %s4588_s1  }
  0x23   : > { %4556 = sst [smem:[#allocation13_spill]] %s3341_s7  ;;  %s44_s18 = sadd.s32 1, %s3361_s12 }
  0x24   : > { %4557 = sst [smem:[#allocation14_spill]] %s3361_s12  ;;  %p45_p10 = scmp.ge.s32.totalorder %s44_s18, 2 }
  0x25   : > { %4558 = sst [smem:[#allocation15_spill]] %s3365_s13  ;;  %s47_s19 = sadd.s32 1, %s3365_s13 }
  0x26   : > { %4559 = sst [smem:[#allocation16_spill]] %s3369_s14  ;;  %s2624_s20 = sadd.s32 4294967294, %s3377_s16  }
  0x27   : > { %4560 = sst [smem:[#allocation17_spill]] %s3373_s15  ;;  %s51_s21 = sadd.s32 1, %s3369_s14 }
  0x28   : > { %4561 = sst [smem:[#allocation18_spill]] %s3377_s16  ;;  %s4591_s18 = smov (%p45_p10, %s44_s18), 0 }
  0x29   : > { %4562 = sst [smem:[#allocation19_spill]] %s4591_s18  ;;  %s4593_s19 = smov (!%p45_p10, %s47_s19), %s3365_s13 }
  0x2a   : > { %p208_p11 = scmp.ne.s32.totalorder %s3341_s7, %s3337_s30  ;;  %p209_p12 = scmp.eq.s32.totalorder %s2623_s17, 15 }
  0x2b   : > { %p49_p13 = scmp.ge.s32.totalorder %s4593_s19, 2  ;;  %p214_p0 = scmp.ne.s32.totalorder %s3337_s30, %s3333_s1 }
  0x2c   : > { %p3504_p1 = por %p209_p12, %p208_p11  ;;  %p215_p2 = scmp.eq.s32.totalorder %s2624_s20, 15 }
  0x2d   : > { %s4595_s19 = smov (%p49_p13, %s4593_s19), 0  ;;  %s4597_s21 = smov (!%p49_p13, %s51_s21), %s3369_s14 }
  0x2e   : > { %4564 = sst [smem:[#allocation20_spill]] %s4595_s19  ;;  %s55_s23 = sadd.s32 1, %s3373_s15 }
  0x2f   : > { %p3512_p3 = por %p215_p2, %p214_p0  ;;  %p53_p4 = scmp.ge.s32.totalorder %s4597_s21, 2 }
  0x30   : > { %p2631_p5 = scmp.ge.s32.totalorder %s3377_s16, 1  ;;  %p309_p6 = scmp.lt.s32.totalorder %s3377_s16, 17 }
  0x31   : > { %s4565_s24 = scalar_select %p3512_p3, 1, 0 }
  0x32   : > { %s4599_s21 = smov (%p53_p4, %s4597_s21), 0  ;;  %s4601_s23 = smov (!%p53_p4, %s55_s23), %s3373_s15 }
  0x33   : > { %4566 = sst [smem:[#allocation21_spill]] %s4565_s24  ;;  %p310_p7 = pnand %p2631_p5, %p309_p6 }
  0x34   : > { %4567 = sst [smem:[#allocation22_spill]] %s4599_s21  ;;  %p57_p8 = scmp.ge.s32.totalorder %s4601_s23, 2 }
  0x35   : > { %s192_s25 = ssub.s32 %s3365_s13, %s4595_s19  ;;  %s194_s26 = ssub.s32 %s3369_s14, %s4599_s21 }
  0x36   : > { %s4603_s23 = smov (%p57_p8, %s4601_s23), 0  ;;  %s198_s0 = sadd.s32 1, %s3341_s7 }
  0x37   : > { %4568 = sst [smem:[#allocation23_spill]] %s4603_s23  ;;  %s191_s27 = ssub.s32 %s3373_s15, %s4603_s23 }
  0x38   : > { %s193_s28 = sor.u32 %s192_s25, %s191_s27  ;;  %s4540_s20 = sand.u32 (!%p310_p7), 1, %s3337_s30  }
  0x39   : > { %s195_s29 = sor.u32 %s194_s26, %s193_s28  ;;  %s3535_s19 = sshll.u32 (!%p310_p7), %s3349_s9, 4 }
  0x3a   : > { %p196_p9 = scmp.eq.s32.totalorder %s195_s29, 0  ;;  %313 = sbr.rel (%p310_p7) target bundleno = 1888 (0x760), region = 36 }
  0x3b   : > { %s3539_s25 = sshll.u32 (!%p310_p7), %s4540_s20, 5  ;;  %p383_p10 = scmp.lt.s32.totalorder (!%p310_p7), %s3357_s11, 1 }
  0x3c   : > { %s3531_s17 = scalar_select %p196_p9, %s3341_s7, %s198_s0  }
  0x3d   : > { %p385_p11 = scmp.lt.s32.totalorder (!%p310_p7), %s3353_s10, 1  ;;  %p387_p12 = scmp.lt.s32.totalorder (!%p310_p7), %s3535_s19, 31 }
  0x3e   : > { %4569 = sst [smem:[#allocation24_spill]] %s3531_s17  ;;  %p2649_p5 = scmp.ne.s32.totalorder (!%p310_p7), %s3345_s8, 0 }
  0x3f   : > { %s384_s26 = scalar_select %p383_p10, %s3357_s11, 1 }
  0x40   : > { %s386_s27 = scalar_select %p385_p11, %s3353_s10, 1 }
  0x41   : > { %s3546_s28 = sshll.u32 %s384_s26, 6  ;;  %s396_s0 = sld [smem:[#allocation6 + %s3349_s9]] }
  0x42   : > { %s3548_s29 = sshll.u32 %s386_s27, 5  ;;  %s418_s20 = sld [smem:[#allocation6 + %s3349_s9]] }
  0x43   : > { %s388_s23 = scalar_select %p387_p12, %s3535_s19, 31 }
  0x44   : > { %s4570_s5 = sld [smem:[#allocation26_spill]] }
  0x45   : > { %s390_s21 = sadd.s32 %s3548_s29, %s388_s23  ;;  %s2648_s18 = sshll.u32 %s388_s23, 3 }
  0x46   : > { %s392_s15 = sadd.s32 %s3546_s28, %s390_s21  ;;  %s3561_s17 = sld [smem:[#allocation6 + %s3349_s9]] }
  0x47   : > { %s2636_s26 = sshll.u32 %s392_s15, 2  ;;  %s4571_s2 = sld [smem:[#allocation25_spill]] }
  0x48   : > { %s2637_s1 = sadd.s32 4294967295, %s396_s0  ;;  %s2642_s23 = sadd.s32 4294967295, %s418_s20 }
  0x49   : > { %p398_p13 = scmp.lt.s32.totalorder %s3345_s8, %s2637_s1  ;;  %p420_p0 = scmp.lt.s32.totalorder %s3345_s8, %s2642_s23 }
  0x4a   : > { %s3558_s12 = scalar_lea.vmem %s4570_s5, %s2648_s18 }
  0x4b   : > { %s399_s21 = scalar_select %p398_p13, %s3345_s8, %s2637_s1 }
  0x4c   : > { %s421_s14 = scalar_select %p420_p0, %s3345_s8, %s2642_s23 }
  0x4d   : > { %s3566_s24 = scalar_lea.vmem %s4571_s2, %s2636_s26  ;;  %s2638_s13 = sshll.u32 %s399_s21, 4 }
  0x4e   : > { %p405_p2 = scmp.lt.s32.totalorder %s2638_s13, 31  ;;  %s2643_s15 = sshll.u32 %s421_s14, 4 }
  0x4f   : > { %p427_p4 = scmp.lt.s32.totalorder %s2643_s15, 31  ;;  %s3587_s23 = scalar_lea.vmem [#allocation8], %s3539_s25 }
  0x50   : > { %s4605_s13 = smov (!%p405_p2, %s2638_s13), 31 }
  0x51   : > { %s408_s18 = sadd.s32 %s3548_s29, %s4605_s13  ;;  %s4607_s15 = smov (!%p427_p4, %s2643_s15), 31 }
  0x52   : > { %s410_s5 = sadd.s32 %s3546_s28, %s408_s18  ;;  %s430_s27 = sadd.s32 %s3548_s29, %s4607_s15 }
  0x53   : > { %s2641_s16 = sshll.u32 %s410_s5, 2  ;;  %s432_s20 = sadd.s32 %s3546_s28, %s430_s27 }
  0x54   : > { %s3577_s0 = scalar_lea.vmem %s4533_s3, %s2641_s16  ;;  %s2646_s1 = sshll.u32 %s432_s20, 2 }
  0x55   : > { %s3584_s21 = scalar_lea.vmem %s4534_s4, %s2646_s1  ;;  %453 = sbr.rel (%p2649_p5) target bundleno = 115 (0x73), region = 40 }
  0x5a   : > { %vm454_vm0 = vcmask 7168   ;;  %vm487_vm1 = vcmask 523264   ;;  %v3381_v0 = vmov -1e+30   ;;  %v3382_v1 = vmov 0.0  }
  0x5b   : > { %455 = vst.msk [vmem:[#allocation2] sm:$0xff] %vm454_vm0, %v3381_v0  ;;  %456 = vst.msk [vmem:[#allocation2 + $0x8] sm:$0xff] %vm454_vm0, %v3381_v0 }
  0x5c   : > { %457 = vst.msk [vmem:[#allocation2 + $0x10] sm:$0xff] %vm454_vm0, %v3381_v0  ;;  %458 = vst.msk [vmem:[#allocation2 + $0x18] sm:$0xff] %vm454_vm0, %v3381_v0 }
  0x5d   : > { %459 = vst.msk [vmem:[#allocation2 + $0x20] sm:$0xff] %vm454_vm0, %v3381_v0  ;;  %460 = vst.msk [vmem:[#allocation2 + $0x28] sm:$0xff] %vm454_vm0, %v3381_v0 }
  0x5e   : > { %461 = vst.msk [vmem:[#allocation2 + $0x30] sm:$0xff] %vm454_vm0, %v3381_v0  ;;  %462 = vst.msk [vmem:[#allocation2 + $0x38] sm:$0xff] %vm454_vm0, %v3381_v0 }
  0x5f   : > { %463 = vst.msk [vmem:[#allocation2 + $0x40] sm:$0xff] %vm454_vm0, %v3381_v0  ;;  %464 = vst.msk [vmem:[#allocation2 + $0x48] sm:$0xff] %vm454_vm0, %v3381_v0 }
  0x60   : > { %465 = vst.msk [vmem:[#allocation2 + $0x50] sm:$0xff] %vm454_vm0, %v3381_v0  ;;  %466 = vst.msk [vmem:[#allocation2 + $0x58] sm:$0xff] %vm454_vm0, %v3381_v0 }
  0x61   : > { %467 = vst.msk [vmem:[#allocation2 + $0x60] sm:$0xff] %vm454_vm0, %v3381_v0  ;;  %468 = vst.msk [vmem:[#allocation2 + $0x68] sm:$0xff] %vm454_vm0, %v3381_v0 }
  0x62   : > { %469 = vst.msk [vmem:[#allocation2 + $0x70] sm:$0xff] %vm454_vm0, %v3381_v0  ;;  %470 = vst.msk [vmem:[#allocation2 + $0x78] sm:$0xff] %vm454_vm0, %v3381_v0 }
  0x63   : > { %471 = vst.msk [vmem:[#allocation3] sm:$0xff] %vm454_vm0, %v3382_v1  ;;  %472 = vst.msk [vmem:[#allocation3 + $0x8] sm:$0xff] %vm454_vm0, %v3382_v1 }
  0x64   : > { %473 = vst.msk [vmem:[#allocation3 + $0x10] sm:$0xff] %vm454_vm0, %v3382_v1  ;;  %474 = vst.msk [vmem:[#allocation3 + $0x18] sm:$0xff] %vm454_vm0, %v3382_v1 }
  0x65   : > { %475 = vst.msk [vmem:[#allocation3 + $0x20] sm:$0xff] %vm454_vm0, %v3382_v1  ;;  %476 = vst.msk [vmem:[#allocation3 + $0x28] sm:$0xff] %vm454_vm0, %v3382_v1 }
  0x66   : > { %477 = vst.msk [vmem:[#allocation3 + $0x30] sm:$0xff] %vm454_vm0, %v3382_v1  ;;  %478 = vst.msk [vmem:[#allocation3 + $0x38] sm:$0xff] %vm454_vm0, %v3382_v1 }
  0x67   : > { %479 = vst.msk [vmem:[#allocation3 + $0x40] sm:$0xff] %vm454_vm0, %v3382_v1  ;;  %480 = vst.msk [vmem:[#allocation3 + $0x48] sm:$0xff] %vm454_vm0, %v3382_v1 }
  0x68   : > { %481 = vst.msk [vmem:[#allocation3 + $0x50] sm:$0xff] %vm454_vm0, %v3382_v1  ;;  %482 = vst.msk [vmem:[#allocation3 + $0x58] sm:$0xff] %vm454_vm0, %v3382_v1 }
  0x69   : > { %483 = vst.msk [vmem:[#allocation3 + $0x60] sm:$0xff] %vm454_vm0, %v3382_v1  ;;  %484 = vst.msk [vmem:[#allocation3 + $0x68] sm:$0xff] %vm454_vm0, %v3382_v1 }
  0x6a   : > { %485 = vst.msk [vmem:[#allocation3 + $0x70] sm:$0xff] %vm454_vm0, %v3382_v1  ;;  %486 = vst.msk [vmem:[#allocation3 + $0x78] sm:$0xff] %vm454_vm0, %v3382_v1 }
  0x6b   : > { %488 = vst.msk [vmem:[#allocation4] sm:$0xff] %vm487_vm1, %v3382_v1  ;;  %489 = vst.msk [vmem:[#allocation4 + $0x8] sm:$0xff] %vm487_vm1, %v3382_v1 }
  0x6c   : > { %490 = vst.msk [vmem:[#allocation4 + $0x10] sm:$0xff] %vm487_vm1, %v3382_v1  ;;  %491 = vst.msk [vmem:[#allocation4 + $0x18] sm:$0xff] %vm487_vm1, %v3382_v1 }
  0x6d   : > { %492 = vst.msk [vmem:[#allocation4 + $0x20] sm:$0xff] %vm487_vm1, %v3382_v1  ;;  %493 = vst.msk [vmem:[#allocation4 + $0x28] sm:$0xff] %vm487_vm1, %v3382_v1 }
  0x6e   : > { %494 = vst.msk [vmem:[#allocation4 + $0x30] sm:$0xff] %vm487_vm1, %v3382_v1  ;;  %495 = vst.msk [vmem:[#allocation4 + $0x38] sm:$0xff] %vm487_vm1, %v3382_v1 }
  0x6f   : > { %496 = vst.msk [vmem:[#allocation4 + $0x40] sm:$0xff] %vm487_vm1, %v3382_v1  ;;  %497 = vst.msk [vmem:[#allocation4 + $0x48] sm:$0xff] %vm487_vm1, %v3382_v1 }
  0x70   : > { %498 = vst.msk [vmem:[#allocation4 + $0x50] sm:$0xff] %vm487_vm1, %v3382_v1  ;;  %499 = vst.msk [vmem:[#allocation4 + $0x58] sm:$0xff] %vm487_vm1, %v3382_v1 }
  0x71   : > { %500 = vst.msk [vmem:[#allocation4 + $0x60] sm:$0xff] %vm487_vm1, %v3382_v1  ;;  %501 = vst.msk [vmem:[#allocation4 + $0x68] sm:$0xff] %vm487_vm1, %v3382_v1 }
  0x72   : > { %502 = vst.msk [vmem:[#allocation4 + $0x70] sm:$0xff] %vm487_vm1, %v3382_v1  ;;  %503 = vst.msk [vmem:[#allocation4 + $0x78] sm:$0xff] %vm487_vm1, %v3382_v1 }
  0x73 PF: > { %p2650_p6 = scmp.ge.s32.totalorder %s3345_s8, %s3561_s17 }
  0x74   : > { %s2712_s2 = sshll.u32 (!%p2650_p6), %s3345_s8, 7  ;;  %s3703_s16 = sld [smem:[#allocation7 + %s3349_s9]] (!%p2650_p6) }
  0x75   : > { %507 = sbr.rel (%p2650_p6) target bundleno = 1577 (0x629), region = 44  ;;  %s3699_s5 = sadd.s32 (!%p2650_p6), 128, %s2712_s2 }
  0x76   : > { %s2676_s6 = sadd.s32 (!%p2650_p6), 4294967295, %s3699_s5 }
  0x7a   : > { %v3037_v2 = vld [vmem:[%s3577_s0 + $0x38] sm:$0xff]   ;;  %vm636_vm2 = vcmask 523264   ;;  %v3038_v3 = vld [vmem:[%s3577_s0 + $0x30] sm:$0xff]   ;;  %v3039_v6 = vld [vmem:[%s3577_s0 + $0x28] sm:$0xff]   ;;  %p2677_p7 = scmp.gt.s32.totalorder %s2676_s6, %s3703_s16 }
  0x7b   : > { %2907 = vmatprep.subr.msk.bf16.mxu0 %vm636_vm2, %v3037_v2  ;;  %2908 = vmatprep.subr.msk.bf16.mxu1 %vm636_vm2, %v3037_v2  ;;  %v683_v4 = vsel %vm636_vm2, %v3037_v2, 0  ;;  %v680_v5 = vsel %vm636_vm2, %v3038_v3, 0  ;;  %v508_v7 = vld [vmem:[%s3566_s24] sm:$0xf]  ;;  %v509_v8 = vld [vmem:[%s3566_s24 + $0x4] sm:$0xf] }
  0x7c   : > { %2764 = vmatpush3.bf16.xpose.msra.mxu0 %v683_v4  ;;  %2867 = vmatpush3.bf16.xpose.msra.mxu1 %v683_v4  ;;  %v524_v9 = vmul.bf16 1040203264, %v508_v7  ;;  %v525_v10 = vmul.bf16 1040203264, %v509_v8  ;;  %v516_v11 = vld [vmem:[%s3566_s24 + $0x20] sm:$0xf] }
  0x7d   : > { %2909 = vmatprep.subr.msk.bf16.mxu0 %vm636_vm2, %v3038_v3  ;;  %2910 = vmatprep.subr.msk.bf16.mxu1 %vm636_vm2, %v3038_v3  ;;  %v517_v12 = vld [vmem:[%s3566_s24 + $0x24] sm:$0xf]  ;;  %v532_v14 = vmul.bf16 1040203264, %v516_v11  ;;  %v677_v17 = vsel %vm636_vm2, %v3039_v6, 0  ;;  %v3041_v20 = vld [vmem:[%s3577_s0 + $0x18] sm:$0xff]  }
  0x7e   : > { %v2651_v13 = vcombine.low %v524_v9, %v525_v10  ;;  %v533_v15 = vmul.bf16 1040203264, %v517_v12  ;;  %v3040_v18 = vld [vmem:[%s3577_s0 + $0x20] sm:$0xff]   ;;  %v671_v21 = vsel %vm636_vm2, %v3041_v20, 0  ;;  %v3042_v22 = vld [vmem:[%s3577_s0 + $0x10] sm:$0xff]   ;;  %v3043_v24 = vld [vmem:[%s3577_s0 + $0x8] sm:$0xff]  }
  0x7f   : > { %v674_v19 = vsel %vm636_vm2, %v3040_v18, 0  ;;  %v668_v23 = vsel %vm636_vm2, %v3042_v22, 0  ;;  %v665_v25 = vsel %vm636_vm2, %v3043_v24, 0  ;;  %v3044_v26 = vld [vmem:[%s3577_s0] sm:$0xff]   ;;  %v510_v28 = vld [vmem:[%s3566_s24 + $0x8] sm:$0xf] }
  0x80   : > { %2779 = vmatprep.mubr.msk.bf16.mxu0 %vm636_vm2, %v2651_v13  ;;  %v2655_v16 = vcombine.low %v532_v14, %v533_v15  ;;  %v662_v27 = vsel %vm636_vm2, %v3044_v26, 0  ;;  %v511_v29 = vld [vmem:[%s3566_s24 + $0xc] sm:$0xf]  ;;  %v518_v30 = vld [vmem:[%s3566_s24 + $0x28] sm:$0xf] }
  0x81   : > { %v519_v31 = vld [vmem:[%s3566_s24 + $0x2c] sm:$0xf]  ;;  %v512_v32 = vld [vmem:[%s3566_s24 + $0x10] sm:$0xf]  ;;  %v513_v33 = vld [vmem:[%s3566_s24 + $0x14] sm:$0xf] }
  0x82   : > { %2787 = vmatprep.mubr.msk.bf16.mxu1 %vm636_vm2, %v2655_v16  ;;  %v520_v34 = vld [vmem:[%s3566_s24 + $0x30] sm:$0xf]  ;;  %v521_v35 = vld [vmem:[%s3566_s24 + $0x34] sm:$0xf]  ;;  %v526_v36 = vmul.bf16 1040203264, %v510_v28 }
  0x83   : > { %v527_v37 = vmul.bf16 1040203264, %v511_v29  ;;  %v534_v38 = vmul.bf16 1040203264, %v518_v30  ;;  %v535_v39 = vmul.bf16 1040203264, %v519_v31 }
  0x84   : > { %2766 = vmatpush3.bf16.xpose.msra.mxu0 %v680_v5  ;;  %2868 = vmatpush3.bf16.xpose.msra.mxu1 %v680_v5  ;;  %v528_v40 = vmul.bf16 1040203264, %v512_v32  ;;  %v529_v41 = vmul.bf16 1040203264, %v513_v33  ;;  %v536_v42 = vmul.bf16 1040203264, %v520_v34 }
  0x85   : > { %2911 = vmatprep.subr.msk.bf16.mxu0 %vm636_vm2, %v3039_v6  ;;  %2912 = vmatprep.subr.msk.bf16.mxu1 %vm636_vm2, %v3039_v6  ;;  %v537_v43 = vmul.bf16 1040203264, %v521_v35  ;;  %v2652_v44 = vcombine.low %v526_v36, %v527_v37  ;;  %v2656_v45 = vcombine.low %v534_v38, %v535_v39  ;;  %v514_v46 = vld [vmem:[%s3566_s24 + $0x18] sm:$0xf]  ;;  %v515_v49 = vld [vmem:[%s3566_s24 + $0x1c] sm:$0xf] }
  0x86   : > { %v2653_v47 = vcombine.low %v528_v40, %v529_v41  ;;  %v522_v50 = vld [vmem:[%s3566_s24 + $0x38] sm:$0xf]  ;;  %v523_v51 = vld [vmem:[%s3566_s24 + $0x3c] sm:$0xf]  ;;  %v530_v52 = vmul.bf16 1040203264, %v514_v46 }
  0x87   : > { %v2657_v48 = vcombine.low %v536_v42, %v537_v43  ;;  %v531_v53 = vmul.bf16 1040203264, %v515_v49  ;;  %v538_v54 = vmul.bf16 1040203264, %v522_v50  ;;  %v539_v55 = vmul.bf16 1040203264, %v523_v51 }
  0x89   : > { %v2654_v56 = vcombine.low %v530_v52, %v531_v53  ;;  %v2658_v57 = vcombine.low %v538_v54, %v539_v55 }
  0x8c   : > { %2768 = vmatpush3.bf16.xpose.msra.mxu0 %v677_v17  ;;  %2869 = vmatpush3.bf16.xpose.msra.mxu1 %v677_v17 }
  0x8d   : > { %2913 = vmatprep.subr.msk.bf16.mxu0 %vm636_vm2, %v3040_v18  ;;  %2914 = vmatprep.subr.msk.bf16.mxu1 %vm636_vm2, %v3040_v18 }
  0x94   : > { %2770 = vmatpush3.bf16.xpose.msra.mxu0 %v674_v19  ;;  %2870 = vmatpush3.bf16.xpose.msra.mxu1 %v674_v19 }
  0x95   : > { %2915 = vmatprep.subr.msk.bf16.mxu0 %vm636_vm2, %v3041_v20  ;;  %2916 = vmatprep.subr.msk.bf16.mxu1 %vm636_vm2, %v3041_v20 }
  0x9c   : > { %2772 = vmatpush3.bf16.xpose.msra.mxu0 %v671_v21  ;;  %2871 = vmatpush3.bf16.xpose.msra.mxu1 %v671_v21 }
  0x9d   : > { %2917 = vmatprep.subr.msk.bf16.mxu0 %vm636_vm2, %v3042_v22  ;;  %2918 = vmatprep.subr.msk.bf16.mxu1 %vm636_vm2, %v3042_v22 }
  0xa4   : > { %2774 = vmatpush3.bf16.xpose.msra.mxu0 %v668_v23  ;;  %2872 = vmatpush3.bf16.xpose.msra.mxu1 %v668_v23 }
  0xa5   : > { %2919 = vmatprep.subr.msk.bf16.mxu0 %vm636_vm2, %v3043_v24  ;;  %2920 = vmatprep.subr.msk.bf16.mxu1 %vm636_vm2, %v3043_v24 }
  0xac   : > { %2776 = vmatpush3.bf16.xpose.msra.mxu0 %v665_v25  ;;  %2873 = vmatpush3.bf16.xpose.msra.mxu1 %v665_v25 }
  0xad   : > { %2921 = vmatprep.subr.msk.bf16.mxu0 %vm636_vm2, %v3044_v26  ;;  %2922 = vmatprep.subr.msk.bf16.mxu1 %vm636_vm2, %v3044_v26 }
  0xb4   : > { %2778 = vmatpush3.bf16.xpose.msra.mxu0 %v662_v27  ;;  %2874 = vmatpush3.bf16.xpose.msra.mxu1 %v662_v27 }
  0xbb   : > { %2780 = vmatmul.mubr.msk.bf16.vlgmr.msra.gmra.mxu0 %vm636_vm2, %v2652_v44  ;;  %2788 = vmatmul.mubr.msk.bf16.vlgmr.msra.gmra.mxu1 %vm636_vm2, %v2656_v45 }
  0xbc   : > { %2783 = vmatprep.mubr.msk.bf16.mxu0 %vm636_vm2, %v2653_v47  ;;  %2791 = vmatprep.mubr.msk.bf16.mxu1 %vm636_vm2, %v2657_v48 }
  0xc3   : > { %2784 = vmatmul.mubr.msk.bf16.gmra.mxu0 %vm636_vm2, %v2654_v56  ;;  %2792 = vmatmul.mubr.msk.bf16.gmra.mxu1 %vm636_vm2, %v2658_v57 }
 0x17b   : > { %v3705_v58 = vpop.f32.mrf.mxu0  ;;  %v3707_v59 = vpop.f32.mrf.mxu1 }
 0x17d   : > { %v3709_v60 = vpop.f32.mrf.mxu0  ;;  %v3711_v61 = vpop.f32.mrf.mxu1 }
 0x17f   : > { %v3713_v62 = vpop.f32.mrf.mxu0  ;;  %v3715_v63 = vpop.f32.mrf.mxu1 }
 0x181   : > { %v3717_v0 = vpop.f32.mrf.mxu0  ;;  %v3719_v1 = vpop.f32.mrf.mxu1 }
 0x183   : > { %v3721_v2 = vpop.f32.mrf.mxu0  ;;  %v3723_v3 = vpop.f32.mrf.mxu1 }
 0x185   : > { %v3725_v4 = vpop.f32.mrf.mxu0  ;;  %v3727_v5 = vpop.f32.mrf.mxu1  ;;  %789 = sbr.rel (%p2677_p7) target bundleno = 924 (0x39c), region = 48 }
 0x187   : > { %v3729_v6 = vpop.f32.mrf.mxu0  ;;  %v3731_v7 = vpop.f32.mrf.mxu1 }
 0x189   : > { %v3733_v8 = vpop.f32.mrf.mxu0  ;;  %v3735_v9 = vpop.f32.mrf.mxu1 }
 0x18a   : > { %822 = vmax.xlane.f32.xlu1 %v3711_v61  ;;  %806 = vmax.xlane.f32.xlu0 %v3709_v60  ;;  %v3383_v10 = vmov 0   ;;  %v3756_v11 = vld [vmem:[#allocation2 + $0x40] sm:$0xff]  ;;  %vm1110_vm3 = vcmask 7168   ;;  %v3761_v17 = vld [vmem:[#allocation2 + $0x48] sm:$0xff]  ;;  %v793_v23 = vld [vmem:[#allocation2 + $0x18] sm:$0xff] }
 0x18b   : > { %3045 = vset.pattern.permute.xlu0 %v3383_v10  ;;  %3046 = vset.pattern.permute.xlu1 %v3383_v10  ;;  %v790_v12 = vld [vmem:[#allocation2] sm:$0xff]  ;;  %v3763_v18 = vld [vmem:[#allocation2 + $0x8] sm:$0xff]  ;;  %v3774_v24 = vld [vmem:[#allocation2 + $0x10] sm:$0xff] }
 0x18c   : > { %v3047_v25 = vld [vmem:[%s3584_s21 + $0x38] sm:$0xff]   ;;  %v3787_v31 = vld [vmem:[#allocation2 + $0x50] sm:$0xff]  ;;  %v795_v38 = vld [vmem:[#allocation2 + $0x28] sm:$0xff] }
 0x18d   : > { %2795 = vmatprep.subr.bf16.mxu0 %v3047_v25  ;;  %2875 = vmatprep.subr.bf16.mxu1 %v3047_v25  ;;  %v3785_v30 = vld [vmem:[#allocation2 + $0x58] sm:$0xff]  ;;  %v3048_v32 = vld [vmem:[%s3584_s21 + $0x30] sm:$0xff]   ;;  %v3800_v39 = vld [vmem:[#allocation2 + $0x20] sm:$0xff] }
 0x18e   : > { %824 = vmax.xlane.f32.xlu1 %v3719_v1  ;;  %808 = vmax.xlane.f32.xlu0 %v3717_v0  ;;  %v3049_v40 = vld [vmem:[%s3584_s21 + $0x28] sm:$0xff]   ;;  %v3813_v48 = vld [vmem:[#allocation2 + $0x60] sm:$0xff]  ;;  %v797_v56 = vld [vmem:[#allocation2 + $0x38] sm:$0xff] }
 0x18f   : > { %2796 = vmatpush3.bf16.msra.mxu0 %v3047_v25  ;;  %2883 = vmatpush3.bf16.msra.mxu1 %v3047_v25  ;;  %v3811_v47 = vld [vmem:[#allocation2 + $0x68] sm:$0xff]  ;;  %v3050_v49 = vld [vmem:[%s3584_s21 + $0x20] sm:$0xff]   ;;  %v3826_v57 = vld [vmem:[#allocation2 + $0x30] sm:$0xff] }
 0x190   : > { %2797 = vmatprep.subr.bf16.mxu0 %v3048_v32  ;;  %2876 = vmatprep.subr.bf16.mxu1 %v3048_v32  ;;  %v3051_v10 = vld [vmem:[%s3584_s21 + $0x18] sm:$0xff]   ;;  %v3052_v25 = vld [vmem:[%s3584_s21 + $0x10] sm:$0xff]  }
 0x192   : > { %812 = vmax.xlane.f32.xlu1 %v3713_v62  ;;  %810 = vmax.xlane.f32.xlu0 %v3705_v58 }
 0x193   : > { %2798 = vmatpush3.bf16.msra.mxu0 %v3048_v32  ;;  %2884 = vmatpush3.bf16.msra.mxu1 %v3048_v32 }
 0x194   : > { %2799 = vmatprep.subr.bf16.mxu0 %v3049_v40  ;;  %2877 = vmatprep.subr.bf16.mxu1 %v3049_v40 }
 0x196   : > { %828 = vmax.xlane.f32.xlu1 %v3715_v63  ;;  %826 = vmax.xlane.f32.xlu0 %v3707_v59 }
 0x197   : > { %2800 = vmatpush3.bf16.msra.mxu0 %v3049_v40  ;;  %2885 = vmatpush3.bf16.msra.mxu1 %v3049_v40  ;;  %v3053_v40 = vld [vmem:[%s3584_s21 + $0x8] sm:$0xff]  }
 0x198   : > { %2801 = vmatprep.subr.bf16.mxu0 %v3050_v49  ;;  %2878 = vmatprep.subr.bf16.mxu1 %v3050_v49 }
 0x19a   : > { %816 = vmax.xlane.f32.xlu1 %v3733_v8  ;;  %814 = vmax.xlane.f32.xlu0 %v3725_v4 }
 0x19b   : > { %2802 = vmatpush3.bf16.msra.mxu0 %v3050_v49  ;;  %2886 = vmatpush3.bf16.msra.mxu1 %v3050_v49 }
 0x19c   : > { %2803 = vmatprep.subr.bf16.mxu0 %v3051_v10  ;;  %2879 = vmatprep.subr.bf16.mxu1 %v3051_v10 }
 0x19e   : > { %832 = vmax.xlane.f32.xlu1 %v3735_v9  ;;  %830 = vmax.xlane.f32.xlu0 %v3727_v5 }
 0x19f   : > { %2804 = vmatpush3.bf16.msra.mxu0 %v3051_v10  ;;  %2887 = vmatpush3.bf16.msra.mxu1 %v3051_v10 }
 0x1a0   : > { %2805 = vmatprep.subr.bf16.mxu0 %v3052_v25  ;;  %2880 = vmatprep.subr.bf16.mxu1 %v3052_v25 }
 0x1a2   : > { %820 = vmax.xlane.f32.xlu1 %v3729_v6  ;;  %818 = vmax.xlane.f32.xlu0 %v3721_v2 }
 0x1a3   : > { %2806 = vmatpush3.bf16.msra.mxu0 %v3052_v25  ;;  %2888 = vmatpush3.bf16.msra.mxu1 %v3052_v25 }
 0x1a4   : > { %2807 = vmatprep.subr.bf16.mxu0 %v3053_v40  ;;  %2881 = vmatprep.subr.bf16.mxu1 %v3053_v40 }
 0x1a6   : > { %836 = vmax.xlane.f32.xlu1 %v3731_v7  ;;  %834 = vmax.xlane.f32.xlu0 %v3723_v3 }
 0x1a7   : > { %2808 = vmatpush3.bf16.msra.mxu0 %v3053_v40  ;;  %2889 = vmatpush3.bf16.msra.mxu1 %v3053_v40 }
 0x213   : > { %v823_v13 = vpop.xlane.xlu1 %822  ;;  %v807_v14 = vpop.xlane.xlu0 %806 }
 0x214   : > { %v3759_v15 = vmax.f32 %v3756_v11, %v823_v13  ;;  %v838_v16 = vmax.f32 %v790_v12, %v807_v14 }
 0x216   : > { %1448 = vst.msk [vmem:[#allocation2 + $0x40] sm:$0xff] %vm1110_vm3, %v3759_v15  ;;  %1440 = vst.msk [vmem:[#allocation2] sm:$0xff] %vm1110_vm3, %v838_v16  ;;  %904 = vperm.xlu0 %3045, %v838_v16   ;;  %v854_v35 = vsub.f32 %v790_v12, %v838_v16 }
 0x217   : > { %v825_v19 = vpop.xlane.xlu1 %824  ;;  %v809_v20 = vpop.xlane.xlu0 %808 }
 0x218   : > { %v3769_v21 = vmax.f32 %v3761_v17, %v825_v19  ;;  %v3772_v22 = vmax.f32 %v3763_v18, %v809_v20  ;;  %v870_v44 = vmul.f32 1.442695, %v854_v35  ;;  %v3837_v20 = vld [vmem:[#allocation2 + $0x78] sm:$0xff] }
 0x21a   : > { %1449 = vst.msk [vmem:[#allocation2 + $0x48] sm:$0xff] %vm1110_vm3, %v3769_v21  ;;  %1441 = vst.msk [vmem:[#allocation2 + $0x8] sm:$0xff] %vm1110_vm3, %v3772_v22  ;;  %909 = vperm.xlu1 %3046, %v3772_v22   ;;  %3055 = vpow2.f32 %v870_v44  ;;  %v3054_v44 = vld [vmem:[%s3584_s21] sm:$0xff]  }
 0x21b   : > { %v813_v26 = vpop.xlane.xlu1 %812  ;;  %v811_v27 = vpop.xlane.xlu0 %810  ;;  %2809 = vmatprep.subr.bf16.mxu0 %v3054_v44  ;;  %2882 = vmatprep.subr.bf16.mxu1 %v3054_v44 }
 0x21c   : > { %v841_v28 = vmax.f32 %v793_v23, %v813_v26  ;;  %v3783_v29 = vmax.f32 %v3774_v24, %v811_v27  ;;  %v863_v27 = vsub.f32 %v3761_v17, %v3769_v21  ;;  %2810 = vmatpush3.bf16.msra.mxu0 %v3054_v44  ;;  %2890 = vmatpush3.bf16.msra.mxu1 %v3054_v44 }
 0x21e   : > { %1443 = vst.msk [vmem:[#allocation2 + $0x18] sm:$0xff] %vm1110_vm3, %v841_v28  ;;  %944 = vperm.xlu1 %3046, %v3759_v15   ;;  %1442 = vst.msk [vmem:[#allocation2 + $0x10] sm:$0xff] %vm1110_vm3, %v3783_v29  ;;  %v857_v41 = vsub.f32 %v793_v23, %v841_v28  ;;  %v3839_v23 = vld [vmem:[#allocation2 + $0x70] sm:$0xff] }
 0x21f   : > { %v829_v33 = vpop.xlane.xlu1 %828  ;;  %v827_v34 = vpop.xlane.xlu0 %826 }
 0x220   : > { %v3795_v36 = vmax.f32 %v3785_v30, %v829_v33  ;;  %v3798_v37 = vmax.f32 %v3787_v31, %v827_v34  ;;  %v876_v50 = vmul.f32 1.442695, %v857_v41  ;;  %v855_v33 = vsub.f32 %v3763_v18, %v3772_v22 }
 0x221   : > { %v856_v22 = vsub.f32 %v3774_v24, %v3783_v29 }
 0x222   : > { %1451 = vst.msk [vmem:[#allocation2 + $0x58] sm:$0xff] %vm1110_vm3, %v3795_v36  ;;  %949 = vperm.xlu1 %3046, %v3769_v21   ;;  %1450 = vst.msk [vmem:[#allocation2 + $0x50] sm:$0xff] %vm1110_vm3, %v3798_v37  ;;  %3057 = vpow2.f32 %v876_v50  ;;  %v888_v21 = vmul.f32 1.442695, %v863_v27  ;;  %v872_v41 = vmul.f32 1.442695, %v855_v33 }
 0x223   : > { %v817_v42 = vpop.xlane.xlu1 %816  ;;  %v815_v43 = vpop.xlane.xlu0 %814  ;;  %v874_v49 = vmul.f32 1.442695, %v856_v22 }
 0x224   : > { %v843_v45 = vmax.f32 %v795_v38, %v817_v42  ;;  %v3809_v46 = vmax.f32 %v3800_v39, %v815_v43  ;;  %v865_v42 = vsub.f32 %v3785_v30, %v3795_v36 }
 0x226   : > { %v859_v51 = vsub.f32 %v795_v38, %v843_v45  ;;  %1445 = vst.msk [vmem:[#allocation2 + $0x28] sm:$0xff] %vm1110_vm3, %v843_v45  ;;  %914 = vperm.xlu1 %3046, %v3783_v29   ;;  %929 = vperm.xlu0 %3045, %v843_v45   ;;  %1444 = vst.msk [vmem:[#allocation2 + $0x20] sm:$0xff] %vm1110_vm3, %v3809_v46  ;;  %v858_v24 = vsub.f32 %v3800_v39, %v3809_v46  ;;  %v892_v29 = vmul.f32 1.442695, %v865_v42 }
 0x227   : > { %v833_v52 = vpop.xlane.xlu1 %832  ;;  %v831_v53 = vpop.xlane.xlu0 %830 }
 0x228   : > { %v3821_v54 = vmax.f32 %v3811_v47, %v833_v52  ;;  %v3824_v55 = vmax.f32 %v3813_v48, %v831_v53  ;;  %v880_v12 = vmul.f32 1.442695, %v859_v51  ;;  %v3871_v43 = vpop.eup %3055  ;;  %v878_v50 = vmul.f32 1.442695, %v858_v24 }
 0x22a   : > { %1453 = vst.msk [vmem:[#allocation2 + $0x68] sm:$0xff] %vm1110_vm3, %v3821_v54  ;;  %919 = vperm.xlu1 %3046, %v841_v28   ;;  %969 = vperm.xlu0 %3045, %v3821_v54   ;;  %1452 = vst.msk [vmem:[#allocation2 + $0x60] sm:$0xff] %vm1110_vm3, %v3824_v55  ;;  %3059 = vpow2.f32 %v880_v12  ;;  %v867_v30 = vsub.f32 %v3811_v47, %v3821_v54  ;;  %v862_v47 = vsub.f32 %v3756_v11, %v3759_v15 }
 0x22b   : > { %v821_v13 = vpop.xlane.xlu1 %820  ;;  %v819_v14 = vpop.xlane.xlu0 %818  ;;  %v866_v10 = vsub.f32 %v3813_v48, %v3824_v55 }
 0x22c   : > { %v845_v16 = vmax.f32 %v797_v56, %v821_v13  ;;  %v3835_v19 = vmax.f32 %v3826_v57, %v819_v14  ;;  %v896_v51 = vmul.f32 1.442695, %v867_v30  ;;  %v886_v54 = vmul.f32 1.442695, %v862_v47 }
 0x22e   : > { %v861_v26 = vsub.f32 %v797_v56, %v845_v16  ;;  %1447 = vst.msk [vmem:[#allocation2 + $0x38] sm:$0xff] %vm1110_vm3, %v845_v16  ;;  %954 = vperm.xlu1 %3046, %v3798_v37   ;;  %939 = vperm.xlu0 %3045, %v845_v16   ;;  %1446 = vst.msk [vmem:[#allocation2 + $0x30] sm:$0xff] %vm1110_vm3, %v3835_v19  ;;  %v860_v39 = vsub.f32 %v3826_v57, %v3835_v19 }
 0x22f   : > { %v837_v28 = vpop.xlane.xlu1 %836  ;;  %v835_v32 = vpop.xlane.xlu0 %834  ;;  %v864_v56 = vsub.f32 %v3787_v31, %v3798_v37  ;;  %v894_v37 = vmul.f32 1.442695, %v866_v10 }
 0x230   : > { %v884_v34 = vmul.f32 1.442695, %v861_v26  ;;  %v3851_v35 = vmax.f32 %v3837_v20, %v837_v28  ;;  %v3854_v38 = vmax.f32 %v3839_v23, %v835_v32  ;;  %v3876_v45 = vpop.eup %3057  ;;  %v882_v52 = vmul.f32 1.442695, %v860_v39 }
 0x231   : > { %v890_v15 = vmul.f32 1.442695, %v864_v56 }
 0x232   : > { %3061 = vpow2.f32 %v884_v34  ;;  %v869_v17 = vsub.f32 %v3837_v20, %v3851_v35  ;;  %1455 = vst.msk [vmem:[#allocation2 + $0x78] sm:$0xff] %vm1110_vm3, %v3851_v35  ;;  %959 = vperm.xlu1 %3046, %v3795_v36   ;;  %979 = vperm.xlu0 %3045, %v3851_v35   ;;  %v868_v18 = vsub.f32 %v3839_v23, %v3854_v38  ;;  %1454 = vst.msk [vmem:[#allocation2 + $0x70] sm:$0xff] %vm1110_vm3, %v3854_v38 }
 0x233   : > { %3063 = vpow2.f32 %v888_v21 }
 0x234   : > { %3065 = vpow2.f32 %v872_v41 }
 0x235   : > { %3067 = vpow2.f32 %v874_v49 }
 0x236   : > { %924 = vperm.xlu1 %3046, %v3809_v46   ;;  %1145 = vperm.xlu0 %3045, %v3871_v43   ;;  %3069 = vpow2.f32 %v892_v29 }
 0x237   : > { %v3884_v36 = vpop.eup %3059  ;;  %3071 = vpow2.f32 %v878_v50 }
 0x238   : > { %3073 = vpow2.f32 %v896_v51 }
 0x239   : > { %3075 = vpow2.f32 %v882_v52 }
 0x23a   : > { %964 = vperm.xlu1 %3046, %v3824_v55   ;;  %1160 = vperm.xlu0 %3045, %v3876_v45   ;;  %3077 = vpow2.f32 %v886_v54 }
 0x23b   : > { %3079 = vpow2.f32 %v890_v15 }
 0x23c   : > { %3081 = vpow2.f32 %v894_v37 }
 0x23e   : > { %934 = vperm.xlu1 %3046, %v3835_v19   ;;  %1170 = vperm.xlu0 %3045, %v3884_v36  }
 0x23f   : > { %v3890_v46 = vpop.eup %3061 }
 0x240   : > { %v3896_v53 = vpop.eup %3063 }
 0x241   : > { %v3900_v57 = vpop.eup %3065 }
 0x242   : > { %974 = vperm.xlu1 %3046, %v3854_v38   ;;  %1180 = vperm.xlu0 %3045, %v3890_v46   ;;  %v3904_v11 = vpop.eup %3067 }
 0x243   : > { %v3908_v12 = vpop.eup %3069 }
 0x244   : > { %v3912_v31 = vpop.eup %3071 }
 0x245   : > { %v3914_v13 = vpop.eup %3073 }
 0x246   : > { %1150 = vperm.xlu1 %3046, %v3900_v57   ;;  %1190 = vperm.xlu0 %3045, %v3896_v53   ;;  %v3918_v14 = vpop.eup %3075 }
 0x247   : > { %v3921_v48 = vpop.eup %3077 }
 0x248   : > { %v3924_v55 = vpop.eup %3079 }
 0x249   : > { %v3927_v16 = vpop.eup %3081 }
 0x24a   : > { %1155 = vperm.xlu1 %3046, %v3904_v11   ;;  %1200 = vperm.xlu0 %3045, %v3908_v12  }
 0x24e   : > { %1165 = vperm.xlu1 %3046, %v3912_v31   ;;  %1210 = vperm.xlu0 %3045, %v3914_v13  }
 0x252   : > { %1175 = vperm.xlu1 %3046, %v3918_v14  }
 0x256   : > { %1185 = vperm.xlu1 %3046, %v3921_v48  }
 0x25a   : > { %1195 = vperm.xlu1 %3046, %v3924_v55  }
 0x25e   : > { %1205 = vperm.xlu1 %3046, %v3927_v16  }
 0x291   : > { %v905_v19 = vpop.permute.xlu0 %904 }
 0x292   : > { %v982_v25 = vsub.f32 %v3709_v60, %v905_v19 }
 0x294   : > { %v998_v26 = vmul.f32 1.442695, %v982_v25 }
 0x295   : > { %v910_v27 = vpop.permute.xlu1 %909 }
 0x296   : > { %3083 = vpow2.f32 %v998_v26  ;;  %v983_v28 = vsub.f32 %v3717_v0, %v910_v27 }
 0x298   : > { %v1000_v32 = vmul.f32 1.442695, %v983_v28 }
 0x299   : > { %v945_v33 = vpop.permute.xlu1 %944 }
 0x29a   : > { %3085 = vpow2.f32 %v1000_v32  ;;  %v990_v34 = vsub.f32 %v3711_v61, %v945_v33 }
 0x29c   : > { %v1014_v40 = vmul.f32 1.442695, %v990_v34 }
 0x29d   : > { %v950_v21 = vpop.permute.xlu1 %949 }
 0x29e   : > { %v991_v22 = vsub.f32 %v3719_v1, %v950_v21  ;;  %3087 = vpow2.f32 %v1014_v40 }
 0x2a0   : > { %v1016_v41 = vmul.f32 1.442695, %v991_v22 }
 0x2a1   : > { %v915_v42 = vpop.permute.xlu1 %914  ;;  %v930_v44 = vpop.permute.xlu0 %929 }
 0x2a2   : > { %3089 = vpow2.f32 %v1016_v41  ;;  %v984_v49 = vsub.f32 %v3705_v58, %v915_v42  ;;  %v987_v30 = vsub.f32 %v3733_v8, %v930_v44 }
 0x2a3   : > { %v3084_v24 = vpop.eup %3083 }
 0x2a4   : > { %v1002_v29 = vmul.f32 1.442695, %v984_v49  ;;  %1062 = vadd.xlane.f32.xlu1 %v3084_v24  ;;  %v1008_v52 = vmul.f32 1.442695, %v987_v30 }
 0x2a5   : > { %v920_v50 = vpop.permute.xlu1 %919  ;;  %v970_v51 = vpop.permute.xlu0 %969 }
 0x2a6   : > { %3091 = vpow2.f32 %v1002_v29  ;;  %v985_v39 = vsub.f32 %v3713_v62, %v920_v50  ;;  %v995_v21 = vsub.f32 %v3735_v9, %v970_v51 }
 0x2a7   : > { %v3086_v47 = vpop.eup %3085 }
 0x2a8   : > { %v1004_v54 = vmul.f32 1.442695, %v985_v39  ;;  %1064 = vadd.xlane.f32.xlu0 %v3086_v47  ;;  %v1239_v56 = vpack.c.bf16 %v3086_v47, %v3084_v24  ;;  %v1024_v49 = vmul.f32 1.442695, %v995_v21 }
 0x2a9   : > { %v955_v15 = vpop.permute.xlu1 %954  ;;  %v940_v10 = vpop.permute.xlu0 %939 }
 0x2aa   : > { %3093 = vpow2.f32 %v1004_v54  ;;  %v992_v37 = vsub.f32 %v3707_v59, %v955_v15  ;;  %v989_v19 = vsub.f32 %v3729_v6, %v940_v10  ;;  %2811 = vmatprep.mubr.bf16.mxu0 %v1239_v56 }
 0x2ab   : > { %3095 = vpow2.f32 %v1008_v52  ;;  %v3939_v28 = vpop.eup %3087 }
 0x2ac   : > { %v1012_v25 = vmul.f32 1.442695, %v989_v19  ;;  %v1018_v26 = vmul.f32 1.442695, %v992_v37 }
 0x2ad   : > { %v960_v27 = vpop.permute.xlu1 %959  ;;  %v980_v29 = vpop.permute.xlu0 %979 }
 0x2ae   : > { %v993_v32 = vsub.f32 %v3715_v63, %v960_v27  ;;  %3097 = vpow2.f32 %v1012_v25  ;;  %v997_v52 = vsub.f32 %v3731_v7, %v980_v29 }
 0x2af   : > { %v3090_v33 = vpop.eup %3089  ;;  %3099 = vpow2.f32 %v1018_v26 }
 0x2b0   : > { %v1020_v34 = vmul.f32 1.442695, %v993_v32  ;;  %v1243_v40 = vpack.c.bf16 %v3090_v33, %v3939_v28  ;;  %v1028_v37 = vmul.f32 1.442695, %v997_v52 }
 0x2b1   : > { %v925_v22 = vpop.permute.xlu1 %924 }
 0x2b2   : > { %3101 = vpow2.f32 %v1020_v34  ;;  %v986_v41 = vsub.f32 %v3725_v4, %v925_v22  ;;  %2819 = vmatprep.mubr.bf16.mxu1 %v1243_v40 }
 0x2b3   : > { %v3092_v42 = vpop.eup %3091 }
 0x2b4   : > { %v1006_v44 = vmul.f32 1.442695, %v986_v41  ;;  %1066 = vadd.xlane.f32.xlu0 %v3092_v42 }
 0x2b5   : > { %v965_v24 = vpop.permute.xlu1 %964 }
 0x2b6   : > { %3103 = vpow2.f32 %v1006_v44  ;;  %v994_v30 = vsub.f32 %v3727_v5, %v965_v24 }
 0x2b7   : > { %v3094_v50 = vpop.eup %3093  ;;  %3105 = vpow2.f32 %v1024_v49 }
 0x2b8   : > { %v1022_v39 = vmul.f32 1.442695, %v994_v30  ;;  %1068 = vadd.xlane.f32.xlu1 %v3094_v50  ;;  %v1240_v47 = vpack.c.bf16 %v3094_v50, %v3092_v42  ;;  %v3096_v51 = vpop.eup %3095  ;;  %v898_v30 = vmul.f32 1.442695, %v868_v18  ;;  %v3964_v18 = vpop.permute.xlu0 %1145 }
 0x2b9   : > { %v935_v54 = vpop.permute.xlu1 %934 }
 0x2ba   : > { %3107 = vpow2.f32 %v1022_v39  ;;  %v988_v56 = vsub.f32 %v3721_v2, %v935_v54  ;;  %2812 = vmatmul.mubr.bf16.vlgmr.msra.gmra.mxu0 %v1240_v47  ;;  %v900_v39 = vmul.f32 1.442695, %v869_v17 }
 0x2bb   : > { %v3098_v10 = vpop.eup %3097 }
 0x2bc   : > { %v1010_v15 = vmul.f32 1.442695, %v988_v56  ;;  %1072 = vadd.xlane.f32.xlu1 %v3096_v51  ;;  %v3100_v25 = vpop.eup %3099  ;;  %v3968_v47 = vpop.permute.xlu0 %1160 }
 0x2bd   : > { %v975_v19 = vpop.permute.xlu1 %974 }
 0x2be   : > { %3109 = vpow2.f32 %v1010_v15  ;;  %v996_v26 = vsub.f32 %v3723_v3, %v975_v19 }
 0x2bf   : > { %v3102_v27 = vpop.eup %3101  ;;  %3111 = vpow2.f32 %v1028_v37  ;;  %v1030_v37 = vld [vmem:[#allocation3] sm:$0xff] }
 0x2c0   : > { %v1026_v32 = vmul.f32 1.442695, %v996_v26  ;;  %1076 = vadd.xlane.f32.xlu1 %v3098_v10  ;;  %v1244_v34 = vpack.c.bf16 %v3102_v27, %v3100_v25  ;;  %v3972_v52 = vpop.permute.xlu0 %1170  ;;  %v1046_v19 = vmul.f32 %v3871_v43, %v1030_v37 }
 0x2c1   : > { %v3962_v38 = vpop.permute.xlu1 %1150 }
 0x2c2   : > { %3113 = vpow2.f32 %v1026_v32  ;;  %2820 = vmatmul.mubr.bf16.vlgmr.msra.gmra.mxu1 %v1244_v34 }
 0x2c3   : > { %v3104_v40 = vpop.eup %3103  ;;  %3115 = vpow2.f32 %v898_v30 }
 0x2c4   : > { %1080 = vadd.xlane.f32.xlu1 %v3090_v33  ;;  %1070 = vadd.xlane.f32.xlu0 %v3104_v40  ;;  %v1241_v21 = vpack.c.bf16 %v3096_v51, %v3104_v40  ;;  %v3106_v22 = vpop.eup %3105  ;;  %3117 = vpow2.f32 %v900_v39  ;;  %v3976_v35 = vpop.permute.xlu0 %1180  ;;  %v1037_v39 = vld [vmem:[#allocation3 + $0x38] sm:$0xff] }
 0x2c6   : > { %2815 = vmatprep.mubr.bf16.mxu0 %v1241_v21 }
 0x2c7   : > { %v3108_v41 = vpop.eup %3107 }
 0x2c8   : > { %1084 = vadd.xlane.f32.xlu1 %v3102_v27  ;;  %v1245_v42 = vpack.c.bf16 %v3106_v22, %v3108_v41  ;;  %v3980_v54 = vpop.permute.xlu0 %1190  ;;  %v1031_v27 = vld [vmem:[#allocation3 + $0x8] sm:$0xff] }
 0x2c9   : > { %v1047_v34 = vmul.f32 %v3900_v57, %v1031_v27  ;;  %v1034_v27 = vld [vmem:[#allocation3 + $0x20] sm:$0xff] }
 0x2ca   : > { %2823 = vmatprep.mubr.bf16.mxu1 %v1245_v42 }
 0x2cb   : > { %v3110_v44 = vpop.eup %3109 }
 0x2cc   : > { %1088 = vadd.xlane.f32.xlu1 %v3106_v22  ;;  %1074 = vadd.xlane.f32.xlu0 %v3110_v44  ;;  %v1242_v49 = vpack.c.bf16 %v3098_v10, %v3110_v44  ;;  %v3112_v24 = vpop.eup %3111  ;;  %v3984_v15 = vpop.permute.xlu0 %1200  ;;  %v1032_v22 = vld [vmem:[#allocation3 + $0x10] sm:$0xff]  ;;  %v1033_v44 = vld [vmem:[#allocation3 + $0x18] sm:$0xff] }
 0x2cd   : > { %v1049_v43 = vmul.f32 %v3876_v45, %v1033_v44  ;;  %v1043_v44 = vld [vmem:[#allocation3 + $0x68] sm:$0xff] }
 0x2ce   : > { %2816 = vmatmul.mubr.bf16.gmra.mxu0 %v1242_v49 }
 0x2cf   : > { %v3114_v29 = vpop.eup %3113 }
 0x2d0   : > { %1092 = vadd.xlane.f32.xlu1 %v3112_v24  ;;  %1078 = vadd.xlane.f32.xlu0 %v3939_v28  ;;  %v1246_v33 = vpack.c.bf16 %v3112_v24, %v3114_v29  ;;  %v3953_v50 = vpop.eup %3115  ;;  %v3966_v28 = vpop.permute.xlu1 %1155 }
 0x2d1   : > { %v3959_v23 = vpop.eup %3117 }
 0x2d2   : > { %2824 = vmatmul.mubr.bf16.gmra.mxu1 %v1246_v33 }
 0x2d4   : > { %1082 = vadd.xlane.f32.xlu0 %v3100_v25  ;;  %v3970_v51 = vpop.permute.xlu1 %1165  ;;  %v3989_v25 = vpop.permute.xlu0 %1210 }
 0x2d8   : > { %1086 = vadd.xlane.f32.xlu0 %v3108_v41  ;;  %v3974_v20 = vpop.permute.xlu1 %1175  ;;  %v1048_v41 = vmul.f32 %v3904_v11, %v1032_v22  ;;  %v1053_v11 = vmul.f32 %v3890_v46, %v1037_v39 }
 0x2dc   : > { %1090 = vadd.xlane.f32.xlu0 %v3114_v29  ;;  %v3978_v17 = vpop.permute.xlu1 %1185  ;;  %v1035_v29 = vld [vmem:[#allocation3 + $0x28] sm:$0xff] }
 0x2dd   : > { %v1051_v57 = vmul.f32 %v3884_v36, %v1035_v29  ;;  %v1041_v36 = vld [vmem:[#allocation3 + $0x58] sm:$0xff] }
 0x2de   : > { %v1057_v46 = vmul.f32 %v3908_v12, %v1041_v36 }
 0x2e0   : > { %v3982_v56 = vpop.permute.xlu1 %1195 }
 0x2e1   : > { %1215 = vperm.xlu1 %3046, %v3953_v50  }
 0x2e4   : > { %v3986_v10 = vpop.permute.xlu1 %1205 }
 0x2f2   : > { %1220 = vperm.xlu0 %3045, %v3959_v23  }
 0x32d   : > { %v1063_v26 = vpop.xlane.xlu1 %1062 }
 0x32e   : > { %v1094_v32 = vadd.f32 %v1063_v26, %v1046_v19  ;;  %v1039_v26 = vld [vmem:[#allocation3 + $0x48] sm:$0xff] }
 0x32f   : > { %v1055_v45 = vmul.f32 %v3896_v53, %v1039_v26  ;;  %v1059_v53 = vmul.f32 %v3914_v13, %v1043_v44  ;;  %v1040_v26 = vld [vmem:[#allocation3 + $0x50] sm:$0xff]  ;;  %v1130_v44 = vld [vmem:[#allocation4 + $0x18] sm:$0xff] }
 0x330   : > { %1111 = vst.msk [vmem:[#allocation3] sm:$0xff] %vm1110_vm3, %v1094_v32 }
 0x331   : > { %v1065_v40 = vpop.xlane.xlu0 %1064 }
 0x332   : > { %v1095_v21 = vadd.f32 %v1065_v40, %v1047_v34  ;;  %v1050_v34 = vmul.f32 %v3912_v31, %v1034_v27 }
 0x334   : > { %1112 = vst.msk [vmem:[#allocation3 + $0x8] sm:$0xff] %vm1110_vm3, %v1095_v21 }
 0x33d   : > { %v1067_v42 = vpop.xlane.xlu0 %1066 }
 0x33e   : > { %v1096_v49 = vadd.f32 %v1067_v42, %v1048_v41 }
 0x340   : > { %1113 = vst.msk [vmem:[#allocation3 + $0x10] sm:$0xff] %vm1110_vm3, %v1096_v49  ;;  %v1036_v49 = vld [vmem:[#allocation3 + $0x30] sm:$0xff] }
 0x341   : > { %v1069_v24 = vpop.xlane.xlu1 %1068  ;;  %v1052_v31 = vmul.f32 %v3918_v14, %v1036_v49  ;;  %v1056_v14 = vmul.f32 %v3924_v55, %v1040_v26  ;;  %v1127_v55 = vld [vmem:[#allocation4] sm:$0xff]  ;;  %v1136_v26 = vld [vmem:[#allocation4 + $0x48] sm:$0xff] }
 0x342   : > { %v1097_v30 = vadd.f32 %v1069_v24, %v1049_v43 }
 0x344   : > { %1114 = vst.msk [vmem:[#allocation3 + $0x18] sm:$0xff] %vm1110_vm3, %v1097_v30  ;;  %v1045_v30 = vld [vmem:[#allocation3 + $0x78] sm:$0xff] }
 0x345   : > { %v1073_v33 = vpop.xlane.xlu1 %1072  ;;  %v1061_v12 = vmul.f32 %v3959_v23, %v1045_v30 }
 0x346   : > { %v1099_v37 = vadd.f32 %v1073_v33, %v1051_v57  ;;  %v1038_v57 = vld [vmem:[#allocation3 + $0x40] sm:$0xff] }
 0x348   : > { %1116 = vst.msk [vmem:[#allocation3 + $0x28] sm:$0xff] %vm1110_vm3, %v1099_v37  ;;  %v1054_v37 = vmul.f32 %v3921_v48, %v1038_v57  ;;  %v1044_v48 = vld [vmem:[#allocation3 + $0x70] sm:$0xff] }
 0x349   : > { %v1077_v19 = vpop.xlane.xlu1 %1076  ;;  %v1060_v36 = vmul.f32 %v3953_v50, %v1044_v48  ;;  %v1141_v48 = vld [vmem:[#allocation4 + $0x70] sm:$0xff] }
 0x34a   : > { %v1101_v32 = vadd.f32 %v1077_v19, %v1053_v11 }
 0x34c   : > { %1118 = vst.msk [vmem:[#allocation3 + $0x38] sm:$0xff] %vm1110_vm3, %v1101_v32 }
 0x34d   : > { %v1081_v40 = vpop.xlane.xlu1 %1080  ;;  %v1071_v21 = vpop.xlane.xlu0 %1070 }
 0x34e   : > { %v1103_v22 = vadd.f32 %v1081_v40, %v1055_v45  ;;  %v1098_v41 = vadd.f32 %v1071_v21, %v1050_v34  ;;  %v1042_v45 = vld [vmem:[#allocation3 + $0x60] sm:$0xff] }
 0x34f   : > { %v1058_v23 = vmul.f32 %v3927_v16, %v1042_v45 }
 0x350   : > { %1120 = vst.msk [vmem:[#allocation3 + $0x48] sm:$0xff] %vm1110_vm3, %v1103_v22  ;;  %1115 = vst.msk [vmem:[#allocation3 + $0x20] sm:$0xff] %vm1110_vm3, %v1098_v41 }
 0x351   : > { %v1085_v42 = vpop.xlane.xlu1 %1084 }
 0x352   : > { %v1105_v43 = vadd.f32 %v1085_v42, %v1057_v46  ;;  %v1129_v46 = vld [vmem:[#allocation4 + $0x10] sm:$0xff] }
 0x353   : > { %v1225_v42 = vmul.f32 %v3966_v28, %v1129_v46  ;;  %v1135_v28 = vld [vmem:[#allocation4 + $0x40] sm:$0xff] }
 0x354   : > { %1122 = vst.msk [vmem:[#allocation3 + $0x58] sm:$0xff] %vm1110_vm3, %v1105_v43  ;;  %v1223_v43 = vmul.f32 %v3964_v18, %v1127_v55  ;;  %v1139_v46 = vld [vmem:[#allocation4 + $0x60] sm:$0xff] }
 0x355   : > { %v1089_v24 = vpop.xlane.xlu1 %1088  ;;  %v1075_v29 = vpop.xlane.xlu0 %1074 }
 0x356   : > { %v1107_v33 = vadd.f32 %v1089_v24, %v1059_v53  ;;  %v1100_v39 = vadd.f32 %v1075_v29, %v1052_v31  ;;  %v1128_v53 = vld [vmem:[#allocation4 + $0x8] sm:$0xff]  ;;  %v1226_v24 = vmul.f32 %v3968_v47, %v1130_v44  ;;  %v1137_v29 = vld [vmem:[#allocation4 + $0x50] sm:$0xff]  ;;  %v1231_v47 = vmul.f32 %v3978_v17, %v1135_v28 }
 0x357   : > { %v1224_v57 = vmul.f32 %v3962_v38, %v1128_v53 }
 0x358   : > { %1124 = vst.msk [vmem:[#allocation3 + $0x68] sm:$0xff] %vm1110_vm3, %v1107_v33  ;;  %1117 = vst.msk [vmem:[#allocation3 + $0x30] sm:$0xff] %vm1110_vm3, %v1100_v39 }
 0x359   : > { %v1093_v11 = vpop.xlane.xlu1 %1092  ;;  %v1079_v19 = vpop.xlane.xlu0 %1078 }
 0x35a   : > { %v1109_v13 = vadd.f32 %v1093_v11, %v1061_v12  ;;  %v1102_v27 = vadd.f32 %v1079_v19, %v1054_v37  ;;  %v1233_v12 = vmul.f32 %v3982_v56, %v1137_v29  ;;  %v1138_v37 = vld [vmem:[#allocation4 + $0x58] sm:$0xff]  ;;  %v1232_v56 = vmul.f32 %v3980_v54, %v1136_v26  ;;  %v1140_v29 = vld [vmem:[#allocation4 + $0x68] sm:$0xff] }
 0x35b   : > { %v1234_v38 = vmul.f32 %v3984_v15, %v1138_v37  ;;  %v1134_v15 = vld [vmem:[#allocation4 + $0x38] sm:$0xff] }
 0x35c   : > { %1126 = vst.msk [vmem:[#allocation3 + $0x78] sm:$0xff] %vm1110_vm3, %v1109_v13  ;;  %1119 = vst.msk [vmem:[#allocation3 + $0x40] sm:$0xff] %vm1110_vm3, %v1102_v27 }
 0x35d   : > { %v1083_v32 = vpop.xlane.xlu0 %1082 }
 0x35e   : > { %v1104_v34 = vadd.f32 %v1083_v32, %v1056_v14 }
 0x360   : > { %1121 = vst.msk [vmem:[#allocation3 + $0x50] sm:$0xff] %vm1110_vm3, %v1104_v34  ;;  %v1133_v34 = vld [vmem:[#allocation4 + $0x30] sm:$0xff] }
 0x361   : > { %v1087_v40 = vpop.xlane.xlu0 %1086 }
 0x362   : > { %v1106_v21 = vadd.f32 %v1087_v40, %v1058_v23  ;;  %v1131_v23 = vld [vmem:[#allocation4 + $0x20] sm:$0xff]  ;;  %v1229_v40 = vmul.f32 %v3974_v20, %v1133_v34 }
 0x364   : > { %1123 = vst.msk [vmem:[#allocation3 + $0x60] sm:$0xff] %vm1110_vm3, %v1106_v21  ;;  %v1216_v21 = vpop.permute.xlu1 %1215 }
 0x365   : > { %v1091_v22 = vpop.xlane.xlu0 %1090  ;;  %v1237_v44 = vmul.f32 %v1216_v21, %v1141_v48 }
 0x366   : > { %v1108_v41 = vadd.f32 %v1091_v22, %v1060_v36  ;;  %v1227_v22 = vmul.f32 %v3970_v51, %v1131_v23 }
 0x368   : > { %1125 = vst.msk [vmem:[#allocation3 + $0x70] sm:$0xff] %vm1110_vm3, %v1108_v41  ;;  %v1132_v41 = vld [vmem:[#allocation4 + $0x28] sm:$0xff] }
 0x37a   : > { %v2813_v49 = vpop.f32.mrf.mxu0 }
 0x37b   : > { %v1410_v16 = vadd.f32 %v2813_v49, %v1225_v42  ;;  %v1230_v42 = vmul.f32 %v3976_v35, %v1134_v15  ;;  %v1221_v49 = vpop.permute.xlu0 %1220 }
 0x37c   : > { %v1345_v31 = vpop.f32.mrf.mxu0 }
 0x37d   : > { %1426 = vst.msk [vmem:[#allocation4 + $0x10] sm:$0xff] %vm636_vm2, %v1410_v16  ;;  %v1408_v50 = vadd.f32 %v1345_v31, %v1223_v43  ;;  %v1142_v16 = vld [vmem:[#allocation4 + $0x78] sm:$0xff]  ;;  %v1228_v31 = vmul.f32 %v3972_v52, %v1132_v41 }
 0x37e   : > { %v2814_v30 = vpop.f32.mrf.mxu0  ;;  %v1238_v35 = vmul.f32 %v1221_v49, %v1142_v16 }
 0x37f   : > { %1424 = vst.msk [vmem:[#allocation4] sm:$0xff] %vm636_vm2, %v1408_v50  ;;  %v1411_v33 = vadd.f32 %v2814_v30, %v1226_v24  ;;  %v1235_v24 = vmul.f32 %v3986_v10, %v1139_v46 }
 0x380   : > { %v1348_v39 = vpop.f32.mrf.mxu0 }
 0x381   : > { %1427 = vst.msk [vmem:[#allocation4 + $0x18] sm:$0xff] %vm636_vm2, %v1411_v33  ;;  %v1409_v18 = vadd.f32 %v1348_v39, %v1224_v57 }
 0x382   : > { %v2821_v11 = vpop.f32.mrf.mxu1 }
 0x383   : > { %1425 = vst.msk [vmem:[#allocation4 + $0x8] sm:$0xff] %vm636_vm2, %v1409_v18  ;;  %v1418_v19 = vadd.f32 %v2821_v11, %v1233_v12  ;;  %v1236_v12 = vmul.f32 %v3989_v25, %v1140_v29 }
 0x384   : > { %v1377_v13 = vpop.f32.mrf.mxu1 }
 0x385   : > { %1434 = vst.msk [vmem:[#allocation4 + $0x50] sm:$0xff] %vm636_vm2, %v1418_v19  ;;  %v1416_v27 = vadd.f32 %v1377_v13, %v1231_v47 }
 0x386   : > { %v2822_v14 = vpop.f32.mrf.mxu1 }
 0x387   : > { %1432 = vst.msk [vmem:[#allocation4 + $0x40] sm:$0xff] %vm636_vm2, %v1416_v27  ;;  %v1419_v32 = vadd.f32 %v2822_v14, %v1234_v38 }
 0x388   : > { %v1380_v45 = vpop.f32.mrf.mxu1 }
 0x389   : > { %1435 = vst.msk [vmem:[#allocation4 + $0x58] sm:$0xff] %vm636_vm2, %v1419_v32  ;;  %v1417_v17 = vadd.f32 %v1380_v45, %v1232_v56 }
 0x38b   : > { %1433 = vst.msk [vmem:[#allocation4 + $0x48] sm:$0xff] %vm636_vm2, %v1417_v17 }
 0x38e   : > { %v2817_v36 = vpop.f32.mrf.mxu0 }
 0x38f   : > { %v1414_v54 = vadd.f32 %v2817_v36, %v1229_v40 }
 0x390   : > { %v1361_v55 = vpop.f32.mrf.mxu0 }
 0x391   : > { %1430 = vst.msk [vmem:[#allocation4 + $0x30] sm:$0xff] %vm636_vm2, %v1414_v54  ;;  %v1412_v43 = vadd.f32 %v1361_v55, %v1227_v22 }
 0x392   : > { %v2818_v53 = vpop.f32.mrf.mxu0  ;;  %v2825_v20 = vpop.f32.mrf.mxu1 }
 0x393   : > { %1428 = vst.msk [vmem:[#allocation4 + $0x20] sm:$0xff] %vm636_vm2, %v1412_v43  ;;  %v1415_v51 = vadd.f32 %v2818_v53, %v1230_v42  ;;  %v1422_v50 = vadd.f32 %v2825_v20, %v1237_v44 }
 0x394   : > { %v1364_v30 = vpop.f32.mrf.mxu0  ;;  %v1393_v57 = vpop.f32.mrf.mxu1 }
 0x395   : > { %1431 = vst.msk [vmem:[#allocation4 + $0x38] sm:$0xff] %vm636_vm2, %v1415_v51  ;;  %1438 = vst.msk [vmem:[#allocation4 + $0x70] sm:$0xff] %vm636_vm2, %v1422_v50  ;;  %v1413_v33 = vadd.f32 %v1364_v30, %v1228_v31  ;;  %v1420_v28 = vadd.f32 %v1393_v57, %v1235_v24 }
 0x396   : > { %v2826_v39 = vpop.f32.mrf.mxu1 }
 0x397   : > { %1429 = vst.msk [vmem:[#allocation4 + $0x28] sm:$0xff] %vm636_vm2, %v1413_v33  ;;  %1436 = vst.msk [vmem:[#allocation4 + $0x60] sm:$0xff] %vm636_vm2, %v1420_v28  ;;  %v1423_v52 = vadd.f32 %v2826_v39, %v1238_v35 }
 0x398   : > { %v1396_v10 = vpop.f32.mrf.mxu1 }
 0x399   : > { %1439 = vst.msk [vmem:[#allocation4 + $0x78] sm:$0xff] %vm636_vm2, %v1423_v52  ;;  %v1421_v18 = vadd.f32 %v1396_v10, %v1236_v12 }
 0x39b   : > { %1437 = vst.msk [vmem:[#allocation4 + $0x68] sm:$0xff] %vm636_vm2, %v1421_v18 }
 0x39c PF: > { %p2686_p8 = scmp.le.s32.totalorder %s2676_s6, %s3703_s16 }
 0x39e   : > { %1459 = sbr.rel (%p2686_p8) target bundleno = 1577 (0x629), region = 52 }
 0x3a3   : > { %v1473_v25 = vld [vmem:[%s3558_s12 + $0x40] sm:$0xff]  ;;  %v3384_v11 = vmov 0   ;;  %v1474_v47 = vld [vmem:[%s3558_s12 + $0x48] sm:$0xff]  ;;  %v1468_v26 = vld [vmem:[%s3558_s12 + $0x18] sm:$0xff]  ;;  %v1461_v15 = vlaneseq  ;;  %v1463_v21 = vstv %s2712_s2 }
 0x3a4   : > { %v1465_v37 = vld [vmem:[%s3558_s12] sm:$0xff]  ;;  %3120 = vset.pattern.permute.xlu1 %v3384_v11  ;;  %3119 = vset.pattern.permute.xlu0 %v3384_v11  ;;  %v1466_v19 = vld [vmem:[%s3558_s12 + $0x8] sm:$0xff]  ;;  %v1467_v13 = vld [vmem:[%s3558_s12 + $0x10] sm:$0xff] }
 0x3a5   : > { %1506 = vperm.xlu1 %3120, %v1473_v25   ;;  %1482 = vperm.xlu0 %3119, %v1465_v37   ;;  %v1476_v38 = vld [vmem:[%s3558_s12 + $0x58] sm:$0xff]  ;;  %v1475_v27 = vld [vmem:[%s3558_s12 + $0x50] sm:$0xff]  ;;  %v1470_v14 = vld [vmem:[%s3558_s12 + $0x28] sm:$0xff]  ;;  %v1462_v48 = vand.u32 127, %v1461_v15 }
 0x3a6   : > { %v1469_v56 = vld [vmem:[%s3558_s12 + $0x20] sm:$0xff]  ;;  %v1478_v32 = vld [vmem:[%s3558_s12 + $0x68] sm:$0xff]  ;;  %v1472_v17 = vld [vmem:[%s3558_s12 + $0x38] sm:$0xff] }
 0x3a7   : > { %v1477_v45 = vld [vmem:[%s3558_s12 + $0x60] sm:$0xff]  ;;  %v1471_v34 = vld [vmem:[%s3558_s12 + $0x30] sm:$0xff]  ;;  %v1480_v23 = vld [vmem:[%s3558_s12 + $0x78] sm:$0xff]  ;;  %v4073_v36 = vadd.s32 %v1463_v21, %v1462_v48 }
 0x3a8   : > { %v1479_v40 = vld [vmem:[%s3558_s12 + $0x70] sm:$0xff]  ;;  %v4155_v35 = vld [vmem:[#allocation2] sm:$0xff]  ;;  %v3121_v33 = vld [vmem:[%s3584_s21 + $0x38] sm:$0xff]  }
 0x3a9   : > { %1509 = vperm.xlu1 %3120, %v1474_v47   ;;  %1485 = vperm.xlu0 %3119, %v1466_v19   ;;  %v1562_v28 = vld [vmem:[#allocation2 + $0x8] sm:$0xff]  ;;  %v4161_v39 = vld [vmem:[#allocation2 + $0x40] sm:$0xff]  ;;  %v4170_v25 = vld [vmem:[#allocation2 + $0x10] sm:$0xff] }
 0x3aa   : > { %2827 = vmatprep.subr.bf16.mxu0 %v3121_v33  ;;  %2891 = vmatprep.subr.bf16.mxu1 %v3121_v33  ;;  %v4172_v37 = vld [vmem:[#allocation2 + $0x48] sm:$0xff]  ;;  %v3125_v15 = vld [vmem:[%s3584_s21 + $0x18] sm:$0xff]  }
 0x3ab   : > { %2828 = vmatpush3.bf16.msra.mxu0 %v3121_v33  ;;  %2899 = vmatpush3.bf16.msra.mxu1 %v3121_v33  ;;  %v3123_v11 = vld [vmem:[%s3584_s21 + $0x28] sm:$0xff]  }
 0x3ad   : > { %1491 = vperm.xlu1 %3120, %v1468_v26   ;;  %1488 = vperm.xlu0 %3119, %v1467_v13  }
 0x3b1   : > { %1515 = vperm.xlu1 %3120, %v1476_v38   ;;  %1512 = vperm.xlu0 %3119, %v1475_v27   ;;  %v4185_v38 = vld [vmem:[#allocation2 + $0x50] sm:$0xff]  ;;  %v4187_v27 = vld [vmem:[#allocation2 + $0x18] sm:$0xff] }
 0x3b5   : > { %1497 = vperm.xlu1 %3120, %v1470_v14   ;;  %1494 = vperm.xlu0 %3119, %v1469_v56   ;;  %v3124_v14 = vld [vmem:[%s3584_s21 + $0x20] sm:$0xff]  }
 0x3b9   : > { %1521 = vperm.xlu1 %3120, %v1478_v32   ;;  %1518 = vperm.xlu0 %3119, %v1477_v45  }
 0x3bd   : > { %1503 = vperm.xlu1 %3120, %v1472_v17   ;;  %1500 = vperm.xlu0 %3119, %v1471_v34  }
 0x3c1   : > { %1527 = vperm.xlu1 %3120, %v1480_v23   ;;  %1524 = vperm.xlu0 %3119, %v1479_v40   ;;  %v1565_v23 = vld [vmem:[#allocation2 + $0x20] sm:$0xff]  ;;  %v4202_v40 = vld [vmem:[#allocation2 + $0x58] sm:$0xff] }
 0x420   : > { %v1507_v22 = vpop.permute.xlu1 %1506  ;;  %v1483_v54 = vpop.permute.xlu0 %1482 }
 0x421   : > { %vm1537_vm4 = vcmp.le.s32.totalorder %v4073_v36, %v1507_v22  ;;  %vm1529_vm5 = vcmp.le.s32.totalorder %v4073_v36, %v1483_v54 }
 0x422   : > { %v4078_v41 = vsel %vm1529_vm5, %v3709_v60, -1e+30  ;;  %v4082_v42 = vsel %vm1537_vm4, %v3711_v61, -1e+30  ;;  %vm1881_vm5 = vcmask 7168  }
 0x423   : > { %1577 = vmax.xlane.f32.xlu0 %v4078_v41 }
 0x424   : > { %v1510_v46 = vpop.permute.xlu1 %1509  ;;  %v1486_v55 = vpop.permute.xlu0 %1485 }
 0x425   : > { %vm1530_vm6 = vcmp.le.s32.totalorder %v4073_v36, %v1486_v55  ;;  %vm1538_vm7 = vcmp.le.s32.totalorder %v4073_v36, %v1510_v46  ;;  %v4216_v55 = vld [vmem:[#allocation2 + $0x60] sm:$0xff] }
 0x426   : > { %v4086_v44 = vsel %vm1530_vm6, %v3717_v0, -1e+30  ;;  %v4096_v61 = vsel %vm1538_vm7, %v3719_v1, -1e+30 }
 0x427   : > { %1579 = vmax.xlane.f32.xlu1 %v4086_v44  ;;  %1593 = vmax.xlane.f32.xlu0 %v4082_v42 }
 0x428   : > { %v1492_v60 = vpop.permute.xlu1 %1491  ;;  %v1489_v49 = vpop.permute.xlu0 %1488 }
 0x429   : > { %vm1531_vm8 = vcmp.le.s32.totalorder %v4073_v36, %v1489_v49  ;;  %vm1532_vm9 = vcmp.le.s32.totalorder %v4073_v36, %v1492_v60  ;;  %v4218_v60 = vld [vmem:[#allocation2 + $0x28] sm:$0xff]  ;;  %v3126_v49 = vld [vmem:[%s3584_s21 + $0x10] sm:$0xff]  }
 0x42a   : > { %v4093_v43 = vsel %vm1531_vm8, %v3705_v58, -1e+30  ;;  %v4106_v20 = vsel %vm1532_vm9, %v3713_v62, -1e+30 }
 0x42b   : > { %1581 = vmax.xlane.f32.xlu1 %v4093_v43  ;;  %1595 = vmax.xlane.f32.xlu0 %v4096_v61 }
 0x42c   : > { %v1516_v0 = vpop.permute.xlu1 %1515  ;;  %v1513_v16 = vpop.permute.xlu0 %1512 }
 0x42d   : > { %vm1539_vm10 = vcmp.le.s32.totalorder %v4073_v36, %v1513_v16  ;;  %vm1540_vm11 = vcmp.le.s32.totalorder %v4073_v36, %v1516_v0 }
 0x42e   : > { %v4103_v53 = vsel %vm1539_vm10, %v3707_v59, -1e+30  ;;  %v4116_v24 = vsel %vm1540_vm11, %v3715_v63, -1e+30 }
 0x42f   : > { %1597 = vmax.xlane.f32.xlu1 %v4103_v53  ;;  %1583 = vmax.xlane.f32.xlu0 %v4106_v20 }
 0x430   : > { %v1498_v58 = vpop.permute.xlu1 %1497  ;;  %v1495_v1 = vpop.permute.xlu0 %1494 }
 0x431   : > { %vm1533_vm12 = vcmp.le.s32.totalorder %v4073_v36, %v1495_v1  ;;  %vm1534_vm13 = vcmp.le.s32.totalorder %v4073_v36, %v1498_v58 }
 0x432   : > { %v4113_v31 = vsel %vm1533_vm12, %v3725_v4, -1e+30  ;;  %v4126_v50 = vsel %vm1534_vm13, %v3733_v8, -1e+30 }
 0x433   : > { %1585 = vmax.xlane.f32.xlu1 %v4113_v31  ;;  %1599 = vmax.xlane.f32.xlu0 %v4116_v24 }
 0x434   : > { %v1522_v59 = vpop.permute.xlu1 %1521  ;;  %v1519_v62 = vpop.permute.xlu0 %1518 }
 0x435   : > { %vm1541_vm14 = vcmp.le.s32.totalorder %v4073_v36, %v1519_v62  ;;  %vm1542_vm15 = vcmp.le.s32.totalorder %v4073_v36, %v1522_v59 }
 0x436   : > { %v4123_v51 = vsel %vm1541_vm14, %v3727_v5, -1e+30  ;;  %v4136_v5 = vsel %vm1542_vm15, %v3735_v9, -1e+30 }
 0x437   : > { %1601 = vmax.xlane.f32.xlu1 %v4123_v51  ;;  %1587 = vmax.xlane.f32.xlu0 %v4126_v50 }
 0x438   : > { %v1504_v63 = vpop.permute.xlu1 %1503  ;;  %v1501_v4 = vpop.permute.xlu0 %1500 }
 0x439   : > { %vm1535_vm0 = vcmp.le.s32.totalorder %v4073_v36, %v1501_v4  ;;  %vm1536_vm1 = vcmp.le.s32.totalorder %v4073_v36, %v1504_v63 }
 0x43a   : > { %v4133_v29 = vsel %vm1535_vm0, %v3721_v2, -1e+30  ;;  %v4146_v2 = vsel %vm1536_vm1, %v3729_v6, -1e+30 }
 0x43b   : > { %1589 = vmax.xlane.f32.xlu1 %v4133_v29  ;;  %1603 = vmax.xlane.f32.xlu0 %v4136_v5 }
 0x43c   : > { %v1528_v8 = vpop.permute.xlu1 %1527  ;;  %v1525_v30 = vpop.permute.xlu0 %1524 }
 0x43d   : > { %vm1543_vm3 = vcmp.le.s32.totalorder %v4073_v36, %v1525_v30  ;;  %vm1544_vm4 = vcmp.le.s32.totalorder %v4073_v36, %v1528_v8  ;;  %v1567_v8 = vld [vmem:[#allocation2 + $0x30] sm:$0xff]  ;;  %v4231_v30 = vld [vmem:[#allocation2 + $0x68] sm:$0xff] }
 0x43e   : > { %v4143_v57 = vsel %vm1543_vm3, %v3723_v3, -1e+30  ;;  %v4152_v9 = vsel %vm1544_vm4, %v3731_v7, -1e+30  ;;  %v3122_v7 = vld [vmem:[%s3584_s21 + $0x30] sm:$0xff]  }
 0x43f   : > { %1605 = vmax.xlane.f32.xlu1 %v4143_v57  ;;  %1591 = vmax.xlane.f32.xlu0 %v4146_v2 }
 0x440   : > { %2829 = vmatprep.subr.bf16.mxu0 %v3122_v7  ;;  %2892 = vmatprep.subr.bf16.mxu1 %v3122_v7 }
 0x441   : > { %2830 = vmatpush3.bf16.msra.mxu0 %v3122_v7  ;;  %2900 = vmatpush3.bf16.msra.mxu1 %v3122_v7 }
 0x442   : > { %2831 = vmatprep.subr.bf16.mxu0 %v3123_v11  ;;  %2893 = vmatprep.subr.bf16.mxu1 %v3123_v11 }
 0x443   : > { %1607 = vmax.xlane.f32.xlu0 %v4152_v9 }
 0x445   : > { %2832 = vmatpush3.bf16.msra.mxu0 %v3123_v11  ;;  %2901 = vmatpush3.bf16.msra.mxu1 %v3123_v11 }
 0x446   : > { %2833 = vmatprep.subr.bf16.mxu0 %v3124_v14  ;;  %2894 = vmatprep.subr.bf16.mxu1 %v3124_v14 }
 0x449   : > { %2834 = vmatpush3.bf16.msra.mxu0 %v3124_v14  ;;  %2902 = vmatpush3.bf16.msra.mxu1 %v3124_v14 }
 0x44a   : > { %2835 = vmatprep.subr.bf16.mxu0 %v3125_v15  ;;  %2895 = vmatprep.subr.bf16.mxu1 %v3125_v15 }
 0x44d   : > { %2836 = vmatpush3.bf16.msra.mxu0 %v3125_v15  ;;  %2903 = vmatpush3.bf16.msra.mxu1 %v3125_v15 }
 0x44e   : > { %2837 = vmatprep.subr.bf16.mxu0 %v3126_v49  ;;  %2896 = vmatprep.subr.bf16.mxu1 %v3126_v49 }
 0x451   : > { %2838 = vmatpush3.bf16.msra.mxu0 %v3126_v49  ;;  %2904 = vmatpush3.bf16.msra.mxu1 %v3126_v49 }
 0x4ac   : > { %v1578_v3 = vpop.xlane.xlu0 %1577 }
 0x4ad   : > { %v4159_v6 = vmax.f32 %v4155_v35, %v1578_v3 }
 0x4af   : > { %2211 = vst.msk [vmem:[#allocation2] sm:$0xff] %vm1881_vm5, %v4159_v6  ;;  %1675 = vperm.xlu1 %3120, %v4159_v6   ;;  %v1625_v48 = vsub.f32 %v4155_v35, %v4159_v6  ;;  %v3127_v35 = vld [vmem:[%s3584_s21 + $0x8] sm:$0xff]  }
 0x4b0   : > { %v1580_v12 = vpop.xlane.xlu1 %1579  ;;  %v1594_v52 = vpop.xlane.xlu0 %1593  ;;  %2839 = vmatprep.subr.bf16.mxu0 %v3127_v35  ;;  %2897 = vmatprep.subr.bf16.mxu1 %v3127_v35 }
 0x4b1   : > { %v1610_v10 = vmax.f32 %v1562_v28, %v1580_v12  ;;  %v4168_v18 = vmax.f32 %v4161_v39, %v1594_v52  ;;  %v1641_v16 = vmul.f32 1.442695, %v1625_v48  ;;  %2840 = vmatpush3.bf16.msra.mxu0 %v3127_v35  ;;  %2905 = vmatpush3.bf16.msra.mxu1 %v3127_v35  ;;  %v4243_v52 = vld [vmem:[#allocation2 + $0x70] sm:$0xff] }
 0x4b3   : > { %2212 = vst.msk [vmem:[#allocation2 + $0x8] sm:$0xff] %vm1881_vm5, %v1610_v10  ;;  %2219 = vst.msk [vmem:[#allocation2 + $0x40] sm:$0xff] %vm1881_vm5, %v4168_v18  ;;  %1680 = vperm.xlu0 %3119, %v1610_v10   ;;  %1715 = vperm.xlu1 %3120, %v4168_v18   ;;  %v1626_v45 = vsub.f32 %v1562_v28, %v1610_v10  ;;  %v1568_v10 = vld [vmem:[#allocation2 + $0x38] sm:$0xff]  ;;  %v1633_v11 = vsub.f32 %v4161_v39, %v4168_v18 }
 0x4b4   : > { %v1582_v47 = vpop.xlane.xlu1 %1581  ;;  %v1596_v19 = vpop.xlane.xlu0 %1595 }
 0x4b5   : > { %v4180_v26 = vmax.f32 %v4170_v25, %v1582_v47  ;;  %v4183_v13 = vmax.f32 %v4172_v37, %v1596_v19  ;;  %v1643_v22 = vmul.f32 1.442695, %v1626_v45  ;;  %v1657_v45 = vmul.f32 1.442695, %v1633_v11 }
 0x4b7   : > { %2213 = vst.msk [vmem:[#allocation2 + $0x10] sm:$0xff] %vm1881_vm5, %v4180_v26  ;;  %2220 = vst.msk [vmem:[#allocation2 + $0x48] sm:$0xff] %vm1881_vm5, %v4183_v13  ;;  %1685 = vperm.xlu0 %3119, %v4180_v26   ;;  %1720 = vperm.xlu1 %3120, %v4183_v13   ;;  %v1627_v58 = vsub.f32 %v4170_v25, %v4180_v26  ;;  %3129 = vpow2.f32 %v1643_v22  ;;  %v3128_v25 = vld [vmem:[%s3584_s21] sm:$0xff]   ;;  %v1634_v49 = vsub.f32 %v4172_v37, %v4183_v13 }
 0x4b8   : > { %v1598_v56 = vpop.xlane.xlu1 %1597  ;;  %v1584_v32 = vpop.xlane.xlu0 %1583  ;;  %3131 = vpow2.f32 %v1641_v16  ;;  %2841 = vmatprep.subr.bf16.mxu0 %v3128_v25  ;;  %2898 = vmatprep.subr.bf16.mxu1 %v3128_v25 }
 0x4b9   : > { %v4197_v17 = vmax.f32 %v4185_v38, %v1598_v56  ;;  %v4200_v34 = vmax.f32 %v4187_v27, %v1584_v32  ;;  %v1645_v33 = vmul.f32 1.442695, %v1627_v58  ;;  %2842 = vmatpush3.bf16.msra.mxu0 %v3128_v25  ;;  %2906 = vmatpush3.bf16.msra.mxu1 %v3128_v25  ;;  %v4256_v32 = vld [vmem:[#allocation2 + $0x78] sm:$0xff] }
 0x4bb   : > { %2221 = vst.msk [vmem:[#allocation2 + $0x50] sm:$0xff] %vm1881_vm5, %v4197_v17  ;;  %2214 = vst.msk [vmem:[#allocation2 + $0x18] sm:$0xff] %vm1881_vm5, %v4200_v34  ;;  %1725 = vperm.xlu0 %3119, %v4197_v17   ;;  %1690 = vperm.xlu1 %3120, %v4200_v34   ;;  %v1628_v3 = vsub.f32 %v4187_v27, %v4200_v34  ;;  %v1635_v34 = vsub.f32 %v4185_v38, %v4197_v17 }
 0x4bc   : > { %v1586_v21 = vpop.xlane.xlu1 %1585  ;;  %v1600_v36 = vpop.xlane.xlu0 %1599 }
 0x4bd   : > { %v1613_v54 = vmax.f32 %v1565_v23, %v1586_v21  ;;  %v4214_v46 = vmax.f32 %v4202_v40, %v1600_v36  ;;  %v1647_v19 = vmul.f32 1.442695, %v1628_v3  ;;  %v1661_v17 = vmul.f32 1.442695, %v1635_v34 }
 0x4bf   : > { %v1629_v0 = vsub.f32 %v1565_v23, %v1613_v54  ;;  %2215 = vst.msk [vmem:[#allocation2 + $0x20] sm:$0xff] %vm1881_vm5, %v1613_v54  ;;  %2222 = vst.msk [vmem:[#allocation2 + $0x58] sm:$0xff] %vm1881_vm5, %v4214_v46  ;;  %1695 = vperm.xlu0 %3119, %v1613_v54   ;;  %1730 = vperm.xlu1 %3120, %v4214_v46  }
 0x4c0   : > { %v1602_v1 = vpop.xlane.xlu1 %1601  ;;  %v1588_v59 = vpop.xlane.xlu0 %1587 }
 0x4c1   : > { %v1649_v62 = vmul.f32 1.442695, %v1629_v0  ;;  %v4228_v63 = vmax.f32 %v4216_v55, %v1602_v1  ;;  %v1614_v4 = vmax.f32 %v4218_v60, %v1588_v59  ;;  %v1659_v1 = vmul.f32 1.442695, %v1634_v49 }
 0x4c2   : > { %v1636_v59 = vsub.f32 %v4202_v40, %v4214_v46 }
 0x4c3   : > { %2223 = vst.msk [vmem:[#allocation2 + $0x60] sm:$0xff] %vm1881_vm5, %v4228_v63  ;;  %2216 = vst.msk [vmem:[#allocation2 + $0x28] sm:$0xff] %vm1881_vm5, %v1614_v4  ;;  %1735 = vperm.xlu0 %3119, %v4228_v63   ;;  %1700 = vperm.xlu1 %3120, %v1614_v4   ;;  %3133 = vpow2.f32 %v1649_v62  ;;  %v1630_v14 = vsub.f32 %v4218_v60, %v1614_v4  ;;  %v1637_v22 = vsub.f32 %v4216_v55, %v4228_v63 }
 0x4c4   : > { %v1590_v6 = vpop.xlane.xlu1 %1589  ;;  %v1604_v28 = vpop.xlane.xlu0 %1603  ;;  %3135 = vpow2.f32 %v1645_v33  ;;  %v1663_v13 = vmul.f32 1.442695, %v1636_v59 }
 0x4c5   : > { %v1615_v7 = vmax.f32 %v1567_v8, %v1590_v6  ;;  %v4241_v12 = vmax.f32 %v4231_v30, %v1604_v28  ;;  %v1651_v48 = vmul.f32 1.442695, %v1630_v14  ;;  %v4269_v38 = vpop.eup %3129  ;;  %v1665_v55 = vmul.f32 1.442695, %v1637_v22 }
 0x4c6   : > { %v4279_v60 = vpop.eup %3131 }
 0x4c7   : > { %v1631_v47 = vsub.f32 %v1567_v8, %v1615_v7  ;;  %2217 = vst.msk [vmem:[#allocation2 + $0x30] sm:$0xff] %vm1881_vm5, %v1615_v7  ;;  %2224 = vst.msk [vmem:[#allocation2 + $0x68] sm:$0xff] %vm1881_vm5, %v4241_v12  ;;  %1705 = vperm.xlu0 %3119, %v1615_v7   ;;  %1740 = vperm.xlu1 %3120, %v4241_v12   ;;  %v1638_v62 = vsub.f32 %v4231_v30, %v4241_v12 }
 0x4c8   : > { %v1606_v26 = vpop.xlane.xlu1 %1605  ;;  %v1592_v27 = vpop.xlane.xlu0 %1591 }
 0x4c9   : > { %v1653_v56 = vmul.f32 1.442695, %v1631_v47  ;;  %v4254_v39 = vmax.f32 %v4243_v52, %v1606_v26  ;;  %v1616_v18 = vmax.f32 %v1568_v10, %v1592_v27  ;;  %v1667_v40 = vmul.f32 1.442695, %v1638_v62 }
 0x4cb   : > { %3137 = vpow2.f32 %v1653_v56  ;;  %v1639_v23 = vsub.f32 %v4243_v52, %v4254_v39  ;;  %2225 = vst.msk [vmem:[#allocation2 + $0x70] sm:$0xff] %vm1881_vm5, %v4254_v39  ;;  %2218 = vst.msk [vmem:[#allocation2 + $0x38] sm:$0xff] %vm1881_vm5, %v1616_v18  ;;  %1745 = vperm.xlu0 %3119, %v4254_v39   ;;  %1710 = vperm.xlu1 %3120, %v1616_v18   ;;  %v1632_v21 = vsub.f32 %v1568_v10, %v1616_v18 }
 0x4cc   : > { %v1608_v15 = vpop.xlane.xlu0 %1607  ;;  %3139 = vpow2.f32 %v1647_v19 }
 0x4cd   : > { %v4267_v36 = vmax.f32 %v4256_v32, %v1608_v15  ;;  %3141 = vpow2.f32 %v1657_v45  ;;  %v1655_v0 = vmul.f32 1.442695, %v1632_v21 }
 0x4ce   : > { %3143 = vpow2.f32 %v1651_v48 }
 0x4cf   : > { %v1640_v54 = vsub.f32 %v4256_v32, %v4267_v36  ;;  %2226 = vst.msk [vmem:[#allocation2 + $0x78] sm:$0xff] %vm1881_vm5, %v4267_v36  ;;  %1921 = vperm.xlu0 %3119, %v4269_v38   ;;  %1750 = vperm.xlu1 %3120, %v4267_v36   ;;  %3145 = vpow2.f32 %v1661_v17 }
 0x4d0   : > { %v4283_v16 = vpop.eup %3133  ;;  %3147 = vpow2.f32 %v1655_v0 }
 0x4d1   : > { %v4287_v58 = vpop.eup %3135  ;;  %3149 = vpow2.f32 %v1665_v55 }
 0x4d2   : > { %3151 = vpow2.f32 %v1659_v1 }
 0x4d3   : > { %1936 = vperm.xlu0 %3119, %v4283_v16   ;;  %1916 = vperm.xlu1 %3120, %v4279_v60   ;;  %3153 = vpow2.f32 %v1663_v13 }
 0x4d4   : > { %3155 = vpow2.f32 %v1667_v40 }
 0x4d7   : > { %1926 = vperm.xlu1 %3120, %v4287_v58  }
 0x4d8   : > { %v4292_v37 = vpop.eup %3137 }
 0x4d9   : > { %1946 = vperm.xlu0 %3119, %v4292_v37   ;;  %v4297_v63 = vpop.eup %3139 }
 0x4da   : > { %v4300_v4 = vpop.eup %3141 }
 0x4db   : > { %1931 = vperm.xlu1 %3120, %v4297_v63   ;;  %v4303_v46 = vpop.eup %3143 }
 0x4dc   : > { %v4306_v8 = vpop.eup %3145 }
 0x4dd   : > { %1956 = vperm.xlu0 %3119, %v4300_v4   ;;  %v4309_v30 = vpop.eup %3147 }
 0x4de   : > { %v4312_v35 = vpop.eup %3149 }
 0x4df   : > { %1941 = vperm.xlu1 %3120, %v4303_v46   ;;  %v4315_v33 = vpop.eup %3151 }
 0x4e0   : > { %v4318_v3 = vpop.eup %3153 }
 0x4e1   : > { %1966 = vperm.xlu0 %3119, %v4306_v8   ;;  %v4321_v6 = vpop.eup %3155 }
 0x4e3   : > { %1951 = vperm.xlu1 %3120, %v4309_v30  }
 0x4e5   : > { %1976 = vperm.xlu0 %3119, %v4312_v35  }
 0x4e7   : > { %1961 = vperm.xlu1 %3120, %v4315_v33  }
 0x4eb   : > { %1971 = vperm.xlu1 %3120, %v4318_v3  }
 0x4ef   : > { %1981 = vperm.xlu1 %3120, %v4321_v6  }
 0x52a   : > { %v1676_v28 = vpop.permute.xlu1 %1675 }
 0x52b   : > { %v1753_v7 = vsub.f32 %v4078_v41, %v1676_v28 }
 0x52d   : > { %v1769_v12 = vmul.f32 1.442695, %v1753_v7 }
 0x52e   : > { %v1716_v10 = vpop.permute.xlu1 %1715  ;;  %v1681_v25 = vpop.permute.xlu0 %1680 }
 0x52f   : > { %3157 = vpow2.f32 %v1769_v12  ;;  %v1761_v11 = vsub.f32 %v4082_v42, %v1716_v10  ;;  %v1754_v47 = vsub.f32 %v4086_v44, %v1681_v25 }
 0x531   : > { %v1771_v19 = vmul.f32 1.442695, %v1754_v47  ;;  %v1785_v26 = vmul.f32 1.442695, %v1761_v11 }
 0x532   : > { %v1721_v27 = vpop.permute.xlu1 %1720  ;;  %v1686_v14 = vpop.permute.xlu0 %1685 }
 0x533   : > { %v1762_v56 = vsub.f32 %v4096_v61, %v1721_v27  ;;  %v1755_v18 = vsub.f32 %v4093_v43, %v1686_v14  ;;  %3159 = vpow2.f32 %v1771_v19 }
 0x534   : > { %3161 = vpow2.f32 %v1785_v26 }
 0x535   : > { %v1787_v45 = vmul.f32 1.442695, %v1762_v56  ;;  %v1773_v34 = vmul.f32 1.442695, %v1755_v18 }
 0x536   : > { %v1691_v41 = vpop.permute.xlu1 %1690  ;;  %v1726_v15 = vpop.permute.xlu0 %1725 }
 0x537   : > { %3163 = vpow2.f32 %v1787_v45  ;;  %v1756_v48 = vsub.f32 %v4106_v20, %v1691_v41  ;;  %v1763_v42 = vsub.f32 %v4103_v53, %v1726_v15 }
 0x538   : > { %3165 = vpow2.f32 %v1773_v34 }
 0x539   : > { %v1775_v44 = vmul.f32 1.442695, %v1756_v48  ;;  %v1789_v21 = vmul.f32 1.442695, %v1763_v42 }
 0x53a   : > { %v1731_v17 = vpop.permute.xlu1 %1730  ;;  %v1696_v22 = vpop.permute.xlu0 %1695 }
 0x53b   : > { %3167 = vpow2.f32 %v1775_v44  ;;  %v1764_v61 = vsub.f32 %v4116_v24, %v1731_v17  ;;  %v1757_v43 = vsub.f32 %v4113_v31, %v1696_v22 }
 0x53c   : > { %v3158_v49 = vpop.eup %3157  ;;  %3169 = vpow2.f32 %v1789_v21 }
 0x53d   : > { %v1791_v0 = vmul.f32 1.442695, %v1764_v61  ;;  %v1777_v55 = vmul.f32 1.442695, %v1757_v43  ;;  %1833 = vadd.xlane.f32.xlu0 %v3158_v49 }
 0x53e   : > { %v1701_v1 = vpop.permute.xlu1 %1700  ;;  %v1736_v59 = vpop.permute.xlu0 %1735 }
 0x53f   : > { %3171 = vpow2.f32 %v1791_v0  ;;  %v1758_v53 = vsub.f32 %v4126_v50, %v1701_v1  ;;  %v1765_v20 = vsub.f32 %v4123_v51, %v1736_v59  ;;  %v1671_v1 = vmul.f32 1.442695, %v1640_v54 }
 0x540   : > { %3173 = vpow2.f32 %v1777_v55  ;;  %v3160_v13 = vpop.eup %3159  ;;  %v1669_v59 = vmul.f32 1.442695, %v1639_v23 }
 0x541   : > { %v1779_v62 = vmul.f32 1.442695, %v1758_v53  ;;  %v1793_v40 = vmul.f32 1.442695, %v1765_v20  ;;  %1835 = vadd.xlane.f32.xlu1 %v3160_v13  ;;  %v2010_v31 = vpack.c.bf16 %v3160_v13, %v3158_v49  ;;  %v3162_v7 = vpop.eup %3161 }
 0x542   : > { %v1741_v24 = vpop.permute.xlu1 %1740  ;;  %v1706_v28 = vpop.permute.xlu0 %1705 }
 0x543   : > { %3175 = vpow2.f32 %v1779_v62  ;;  %v1766_v12 = vsub.f32 %v4136_v5, %v1741_v24  ;;  %v1759_v10 = vsub.f32 %v4133_v29, %v1706_v28  ;;  %2843 = vmatprep.mubr.bf16.mxu0 %v2010_v31 }
 0x544   : > { %v3164_v25 = vpop.eup %3163  ;;  %3177 = vpow2.f32 %v1793_v40 }
 0x545   : > { %v3166_v11 = vpop.eup %3165  ;;  %v1795_v50 = vmul.f32 1.442695, %v1766_v12  ;;  %v1781_v47 = vmul.f32 1.442695, %v1759_v10  ;;  %v2014_v51 = vpack.c.bf16 %v3164_v25, %v3162_v7  ;;  %v1801_v12 = vld [vmem:[#allocation3] sm:$0xff] }
 0x546   : > { %1837 = vadd.xlane.f32.xlu0 %v3166_v11  ;;  %v1711_v19 = vpop.permute.xlu1 %1710  ;;  %v1746_v26 = vpop.permute.xlu0 %1745  ;;  %v1817_v10 = vmul.f32 %v4279_v60, %v1801_v12 }
 0x547   : > { %3179 = vpow2.f32 %v1795_v50  ;;  %v1760_v27 = vsub.f32 %v4146_v2, %v1711_v19  ;;  %v1767_v14 = vsub.f32 %v4143_v57, %v1746_v26  ;;  %2851 = vmatprep.mubr.bf16.mxu1 %v2014_v51  ;;  %v1803_v26 = vld [vmem:[#allocation3 + $0x10] sm:$0xff] }
 0x548   : > { %v3168_v56 = vpop.eup %3167  ;;  %3181 = vpow2.f32 %v1781_v47  ;;  %v1802_v47 = vld [vmem:[#allocation3 + $0x8] sm:$0xff] }
 0x549   : > { %v1783_v5 = vmul.f32 1.442695, %v1760_v27  ;;  %v2011_v29 = vpack.c.bf16 %v3168_v56, %v3166_v11  ;;  %v1797_v18 = vmul.f32 1.442695, %v1767_v14  ;;  %v3170_v34 = vpop.eup %3169  ;;  %v1818_v51 = vmul.f32 %v4269_v38, %v1802_v47 }
 0x54a   : > { %1839 = vadd.xlane.f32.xlu0 %v3168_v56  ;;  %v1751_v45 = vpop.permute.xlu1 %1750  ;;  %v4356_v36 = vpop.permute.xlu0 %1921  ;;  %v1819_v14 = vmul.f32 %v4287_v58, %v1803_v26 }
 0x54b   : > { %3183 = vpow2.f32 %v1783_v5  ;;  %v1768_v41 = vsub.f32 %v4152_v9, %v1751_v45  ;;  %2844 = vmatmul.mubr.bf16.vlgmr.msra.gmra.mxu0 %v2011_v29  ;;  %v1804_v5 = vld [vmem:[#allocation3 + $0x18] sm:$0xff]  ;;  %v1805_v45 = vld [vmem:[#allocation3 + $0x20] sm:$0xff] }
 0x54c   : > { %v3172_v15 = vpop.eup %3171  ;;  %3185 = vpow2.f32 %v1797_v18  ;;  %v1820_v60 = vmul.f32 %v4297_v63, %v1804_v5  ;;  %v1821_v38 = vmul.f32 %v4283_v16, %v1805_v45 }
 0x54d   : > { %v3174_v48 = vpop.eup %3173  ;;  %v1799_v42 = vmul.f32 1.442695, %v1768_v41  ;;  %v2015_v44 = vpack.c.bf16 %v3172_v15, %v3170_v34  ;;  %v1806_v41 = vld [vmem:[#allocation3 + $0x28] sm:$0xff] }
 0x54e   : > { %1841 = vadd.xlane.f32.xlu1 %v3174_v48  ;;  %v4352_v13 = vpop.permute.xlu1 %1916  ;;  %v4360_v62 = vpop.permute.xlu0 %1936 }
 0x54f   : > { %3187 = vpow2.f32 %v1799_v42  ;;  %2852 = vmatmul.mubr.bf16.vlgmr.msra.gmra.mxu1 %v2015_v44  ;;  %v1822_v42 = vmul.f32 %v4303_v46, %v1806_v41 }
 0x550   : > { %v3176_v57 = vpop.eup %3175  ;;  %3189 = vpow2.f32 %v1671_v1 }
 0x551   : > { %1843 = vadd.xlane.f32.xlu0 %v3176_v57  ;;  %v2012_v2 = vpack.c.bf16 %v3176_v57, %v3174_v48  ;;  %v3178_v21 = vpop.eup %3177  ;;  %3191 = vpow2.f32 %v1669_v59  ;;  %v1807_v57 = vld [vmem:[#allocation3 + $0x30] sm:$0xff] }
 0x552   : > { %v4354_v32 = vpop.permute.xlu1 %1926  ;;  %v1823_v63 = vmul.f32 %v4292_v37, %v1807_v57  ;;  %v1906_v57 = vld [vmem:[#allocation4 + $0x40] sm:$0xff] }
 0x553   : > { %2847 = vmatprep.mubr.bf16.mxu0 %v2012_v2  ;;  %v1808_v2 = vld [vmem:[#allocation3 + $0x38] sm:$0xff] }
 0x554   : > { %v3180_v17 = vpop.eup %3179  ;;  %v4364_v39 = vpop.permute.xlu0 %1946  ;;  %v1824_v16 = vmul.f32 %v4309_v30, %v1808_v2  ;;  %v1812_v30 = vld [vmem:[#allocation3 + $0x58] sm:$0xff] }
 0x555   : > { %v3182_v22 = vpop.eup %3181  ;;  %v2016_v61 = vpack.c.bf16 %v3180_v17, %v3178_v21 }
 0x556   : > { %1845 = vadd.xlane.f32.xlu1 %v3182_v22  ;;  %v4358_v54 = vpop.permute.xlu1 %1931 }
 0x557   : > { %2855 = vmatprep.mubr.bf16.mxu1 %v2016_v61 }
 0x558   : > { %v3184_v9 = vpop.eup %3183  ;;  %v4368_v40 = vpop.permute.xlu0 %1956 }
 0x559   : > { %1847 = vadd.xlane.f32.xlu0 %v3184_v9  ;;  %v2013_v43 = vpack.c.bf16 %v3184_v9, %v3182_v22  ;;  %v3186_v49 = vpop.eup %3185  ;;  %v1810_v9 = vld [vmem:[#allocation3 + $0x48] sm:$0xff] }
 0x55a   : > { %1849 = vadd.xlane.f32.xlu1 %v3162_v7  ;;  %v4362_v52 = vpop.permute.xlu1 %1941  ;;  %v1826_v37 = vmul.f32 %v4315_v33, %v1810_v9  ;;  %v1814_v33 = vld [vmem:[#allocation3 + $0x68] sm:$0xff] }
 0x55b   : > { %2848 = vmatmul.mubr.bf16.gmra.mxu0 %v2013_v43  ;;  %v1907_v9 = vld [vmem:[#allocation4 + $0x48] sm:$0xff] }
 0x55c   : > { %v3188_v0 = vpop.eup %3187  ;;  %v4372_v28 = vpop.permute.xlu0 %1966 }
 0x55d   : > { %1851 = vadd.xlane.f32.xlu0 %v3164_v25  ;;  %v2017_v55 = vpack.c.bf16 %v3188_v0, %v3186_v49  ;;  %v4346_v53 = vpop.eup %3189 }
 0x55e   : > { %1853 = vadd.xlane.f32.xlu1 %v3170_v34  ;;  %v4349_v20 = vpop.eup %3191  ;;  %v4366_v23 = vpop.permute.xlu1 %1951 }
 0x55f   : > { %2856 = vmatmul.mubr.bf16.gmra.mxu1 %v2017_v55 }
 0x560   : > { %v4376_v7 = vpop.permute.xlu0 %1976 }
 0x561   : > { %1855 = vadd.xlane.f32.xlu0 %v3172_v15 }
 0x562   : > { %1857 = vadd.xlane.f32.xlu1 %v3178_v21  ;;  %v4370_v24 = vpop.permute.xlu1 %1961 }
 0x565   : > { %1859 = vadd.xlane.f32.xlu0 %v3180_v17  ;;  %v1809_v17 = vld [vmem:[#allocation3 + $0x40] sm:$0xff] }
 0x566   : > { %1861 = vadd.xlane.f32.xlu1 %v3186_v49  ;;  %v4374_v31 = vpop.permute.xlu1 %1971  ;;  %v1825_v61 = vmul.f32 %v4300_v4, %v1809_v17  ;;  %v1909_v17 = vld [vmem:[#allocation4 + $0x58] sm:$0xff] }
 0x569   : > { %1863 = vadd.xlane.f32.xlu0 %v3188_v0  ;;  %v1811_v0 = vld [vmem:[#allocation3 + $0x50] sm:$0xff] }
 0x56a   : > { %v4379_v11 = vpop.permute.xlu1 %1981  ;;  %v1827_v1 = vmul.f32 %v4306_v8, %v1811_v0 }
 0x577   : > { %1991 = vperm.xlu1 %3120, %v4346_v53  }
 0x57f   : > { %1986 = vperm.xlu0 %3119, %v4349_v20  }
 0x5c6   : > { %v1834_v25 = vpop.xlane.xlu0 %1833 }
 0x5c7   : > { %v1865_v50 = vadd.f32 %v1834_v25, %v1817_v10  ;;  %v1813_v25 = vld [vmem:[#allocation3 + $0x60] sm:$0xff] }
 0x5c8   : > { %v1829_v47 = vmul.f32 %v4312_v35, %v1813_v25 }
 0x5c9   : > { %1882 = vst.msk [vmem:[#allocation3] sm:$0xff] %vm1881_vm5, %v1865_v50  ;;  %v1828_v50 = vmul.f32 %v4318_v3, %v1812_v30  ;;  %v1816_v3 = vld [vmem:[#allocation3 + $0x78] sm:$0xff] }
 0x5ca   : > { %v1836_v19 = vpop.xlane.xlu1 %1835  ;;  %v1832_v35 = vmul.f32 %v4346_v53, %v1816_v3 }
 0x5cb   : > { %v1866_v27 = vadd.f32 %v1836_v19, %v1818_v51 }
 0x5cd   : > { %1883 = vst.msk [vmem:[#allocation3 + $0x8] sm:$0xff] %vm1881_vm5, %v1866_v27  ;;  %v1815_v27 = vld [vmem:[#allocation3 + $0x70] sm:$0xff] }
 0x5cf   : > { %v1838_v56 = vpop.xlane.xlu0 %1837 }
 0x5d0   : > { %v1867_v29 = vadd.f32 %v1838_v56, %v1819_v14  ;;  %v1830_v14 = vmul.f32 %v4321_v6, %v1814_v33  ;;  %v1831_v56 = vmul.f32 %v4349_v20, %v1815_v27  ;;  %v1900_v6 = vld [vmem:[#allocation4 + $0x10] sm:$0xff]  ;;  %v1901_v20 = vld [vmem:[#allocation4 + $0x18] sm:$0xff] }
 0x5d1   : > { %v1996_v41 = vmul.f32 %v4354_v32, %v1900_v6  ;;  %v1997_v53 = vmul.f32 %v4358_v54, %v1901_v20  ;;  %v2005_v54 = vmul.f32 %v4374_v31, %v1909_v17  ;;  %v1902_v31 = vld [vmem:[#allocation4 + $0x20] sm:$0xff] }
 0x5d2   : > { %1884 = vst.msk [vmem:[#allocation3 + $0x10] sm:$0xff] %vm1881_vm5, %v1867_v29 }
 0x5d3   : > { %v1840_v18 = vpop.xlane.xlu0 %1839 }
 0x5d4   : > { %v1868_v34 = vadd.f32 %v1840_v18, %v1820_v60 }
 0x5d6   : > { %1885 = vst.msk [vmem:[#allocation3 + $0x18] sm:$0xff] %vm1881_vm5, %v1868_v34 }
 0x5d7   : > { %v1842_v15 = vpop.xlane.xlu1 %1841 }
 0x5d8   : > { %v1869_v48 = vadd.f32 %v1842_v15, %v1821_v38  ;;  %v1898_v38 = vld [vmem:[#allocation4] sm:$0xff]  ;;  %v1908_v15 = vld [vmem:[#allocation4 + $0x50] sm:$0xff] }
 0x5d9   : > { %v2004_v2 = vmul.f32 %v4372_v28, %v1908_v15 }
 0x5da   : > { %1886 = vst.msk [vmem:[#allocation3 + $0x20] sm:$0xff] %vm1881_vm5, %v1869_v48  ;;  %v1844_v58 = vpop.xlane.xlu0 %1843 }
 0x5db   : > { %v1870_v44 = vadd.f32 %v1844_v58, %v1822_v42  ;;  %v1994_v42 = vmul.f32 %v4352_v13, %v1898_v38 }
 0x5dd   : > { %1887 = vst.msk [vmem:[#allocation3 + $0x28] sm:$0xff] %vm1881_vm5, %v1870_v44  ;;  %v1899_v44 = vld [vmem:[#allocation4 + $0x8] sm:$0xff] }
 0x5de   : > { %v1995_v32 = vmul.f32 %v4356_v36, %v1899_v44  ;;  %v2003_v36 = vmul.f32 %v4370_v24, %v1907_v9  ;;  %v1998_v24 = vmul.f32 %v4360_v62, %v1902_v31 }
 0x5df   : > { %v1846_v21 = vpop.xlane.xlu1 %1845 }
 0x5e0   : > { %v1871_v22 = vadd.f32 %v1846_v21, %v1823_v63 }
 0x5e2   : > { %1888 = vst.msk [vmem:[#allocation3 + $0x30] sm:$0xff] %vm1881_vm5, %v1871_v22  ;;  %v1848_v46 = vpop.xlane.xlu0 %1847 }
 0x5e3   : > { %v1850_v43 = vpop.xlane.xlu1 %1849  ;;  %v1872_v49 = vadd.f32 %v1848_v46, %v1824_v16 }
 0x5e4   : > { %v1873_v55 = vadd.f32 %v1850_v43, %v1825_v61  ;;  %v2002_v61 = vmul.f32 %v4368_v40, %v1906_v57 }
 0x5e5   : > { %1889 = vst.msk [vmem:[#allocation3 + $0x38] sm:$0xff] %vm1881_vm5, %v1872_v49 }
 0x5e6   : > { %1890 = vst.msk [vmem:[#allocation3 + $0x40] sm:$0xff] %vm1881_vm5, %v1873_v55  ;;  %v1852_v59 = vpop.xlane.xlu0 %1851 }
 0x5e7   : > { %v1854_v12 = vpop.xlane.xlu1 %1853  ;;  %v1874_v10 = vadd.f32 %v1852_v59, %v1826_v37  ;;  %v1904_v59 = vld [vmem:[#allocation4 + $0x30] sm:$0xff] }
 0x5e8   : > { %v1875_v4 = vadd.f32 %v1854_v12, %v1827_v1  ;;  %v2000_v30 = vmul.f32 %v4364_v39, %v1904_v59  ;;  %v1905_v12 = vld [vmem:[#allocation4 + $0x38] sm:$0xff] }
 0x5e9   : > { %1891 = vst.msk [vmem:[#allocation3 + $0x48] sm:$0xff] %vm1881_vm5, %v1874_v10  ;;  %v1912_v10 = vld [vmem:[#allocation4 + $0x70] sm:$0xff] }
 0x5ea   : > { %1892 = vst.msk [vmem:[#allocation3 + $0x50] sm:$0xff] %vm1881_vm5, %v1875_v4  ;;  %v1856_v51 = vpop.xlane.xlu0 %1855 }
 0x5eb   : > { %v1858_v19 = vpop.xlane.xlu1 %1857  ;;  %v1876_v26 = vadd.f32 %v1856_v51, %v1828_v50  ;;  %v1910_v51 = vld [vmem:[#allocation4 + $0x60] sm:$0xff] }
 0x5ec   : > { %v1877_v8 = vadd.f32 %v1858_v19, %v1829_v47  ;;  %v1903_v47 = vld [vmem:[#allocation4 + $0x28] sm:$0xff]  ;;  %v2001_v19 = vmul.f32 %v4366_v23, %v1905_v12  ;;  %v2006_v3 = vmul.f32 %v4376_v7, %v1910_v51 }
 0x5ed   : > { %1893 = vst.msk [vmem:[#allocation3 + $0x58] sm:$0xff] %vm1881_vm5, %v1876_v26 }
 0x5ee   : > { %1894 = vst.msk [vmem:[#allocation3 + $0x60] sm:$0xff] %vm1881_vm5, %v1877_v8  ;;  %v1860_v5 = vpop.xlane.xlu0 %1859 }
 0x5ef   : > { %v1862_v29 = vpop.xlane.xlu1 %1861  ;;  %v1878_v60 = vadd.f32 %v1860_v5, %v1830_v14  ;;  %v1913_v14 = vld [vmem:[#allocation4 + $0x78] sm:$0xff]  ;;  %v1999_v5 = vmul.f32 %v4362_v52, %v1903_v47 }
 0x5f0   : > { %v1879_v18 = vadd.f32 %v1862_v29, %v1831_v56 }
 0x5f1   : > { %1895 = vst.msk [vmem:[#allocation3 + $0x68] sm:$0xff] %vm1881_vm5, %v1878_v60  ;;  %v1911_v60 = vld [vmem:[#allocation4 + $0x68] sm:$0xff] }
 0x5f2   : > { %1896 = vst.msk [vmem:[#allocation3 + $0x70] sm:$0xff] %vm1881_vm5, %v1879_v18  ;;  %v1864_v45 = vpop.xlane.xlu0 %1863  ;;  %v2007_v38 = vmul.f32 %v4379_v11, %v1911_v60 }
 0x5f3   : > { %v1880_v34 = vadd.f32 %v1864_v45, %v1832_v35  ;;  %v1992_v26 = vpop.permute.xlu1 %1991 }
 0x5f4   : > { %v2009_v23 = vmul.f32 %v1992_v26, %v1913_v14 }
 0x5f5   : > { %1897 = vst.msk [vmem:[#allocation3 + $0x78] sm:$0xff] %vm1881_vm5, %v1880_v34 }
 0x5fa   : > { %v1987_v25 = vpop.permute.xlu0 %1986 }
 0x5fb   : > { %v2008_v27 = vmul.f32 %v1987_v25, %v1912_v10 }
 0x60b   : > { %v2845_v48 = vpop.f32.mrf.mxu0 }
 0x60c   : > { %v2181_v58 = vadd.f32 %v2845_v48, %v1996_v41 }
 0x60d   : > { %v2116_v63 = vpop.f32.mrf.mxu0 }
 0x60e   : > { %2197 = vst.msk [vmem:[#allocation4 + $0x10] sm:$0xff] %vm636_vm2, %v2181_v58  ;;  %v2179_v21 = vadd.f32 %v2116_v63, %v1994_v42 }
 0x60f   : > { %v2846_v22 = vpop.f32.mrf.mxu0  ;;  %v2853_v16 = vpop.f32.mrf.mxu1 }
 0x610   : > { %2195 = vst.msk [vmem:[#allocation4] sm:$0xff] %vm636_vm2, %v2179_v21  ;;  %v2182_v13 = vadd.f32 %v2846_v22, %v1997_v53  ;;  %v2189_v46 = vadd.f32 %v2853_v16, %v2004_v2 }
 0x611   : > { %v2119_v43 = vpop.f32.mrf.mxu0  ;;  %v2148_v49 = vpop.f32.mrf.mxu1 }
 0x612   : > { %2198 = vst.msk [vmem:[#allocation4 + $0x18] sm:$0xff] %vm636_vm2, %v2182_v13  ;;  %2205 = vst.msk [vmem:[#allocation4 + $0x50] sm:$0xff] %vm636_vm2, %v2189_v46  ;;  %v2180_v28 = vadd.f32 %v2119_v43, %v1995_v32  ;;  %v2187_v0 = vadd.f32 %v2148_v49, %v2002_v61 }
 0x613   : > { %v2854_v55 = vpop.f32.mrf.mxu1 }
 0x614   : > { %2196 = vst.msk [vmem:[#allocation4 + $0x8] sm:$0xff] %vm636_vm2, %v2180_v28  ;;  %2203 = vst.msk [vmem:[#allocation4 + $0x40] sm:$0xff] %vm636_vm2, %v2187_v0  ;;  %v2190_v40 = vadd.f32 %v2854_v55, %v2005_v54 }
 0x615   : > { %v2151_v37 = vpop.f32.mrf.mxu1 }
 0x616   : > { %2206 = vst.msk [vmem:[#allocation4 + $0x58] sm:$0xff] %vm636_vm2, %v2190_v40  ;;  %v2188_v1 = vadd.f32 %v2151_v37, %v2003_v36 }
 0x618   : > { %2204 = vst.msk [vmem:[#allocation4 + $0x48] sm:$0xff] %vm636_vm2, %v2188_v1 }
 0x61b   : > { %v2849_v4 = vpop.f32.mrf.mxu0 }
 0x61c   : > { %v2185_v50 = vadd.f32 %v2849_v4, %v2000_v30 }
 0x61d   : > { %v2132_v33 = vpop.f32.mrf.mxu0 }
 0x61e   : > { %2201 = vst.msk [vmem:[#allocation4 + $0x30] sm:$0xff] %vm636_vm2, %v2185_v50  ;;  %v2183_v8 = vadd.f32 %v2132_v33, %v1998_v24 }
 0x61f   : > { %v2850_v56 = vpop.f32.mrf.mxu0  ;;  %v2857_v39 = vpop.f32.mrf.mxu1 }
 0x620   : > { %2199 = vst.msk [vmem:[#allocation4 + $0x20] sm:$0xff] %vm636_vm2, %v2183_v8  ;;  %v2186_v62 = vadd.f32 %v2850_v56, %v2001_v19  ;;  %v2193_v29 = vadd.f32 %v2857_v39, %v2008_v27 }
 0x621   : > { %v2135_v18 = vpop.f32.mrf.mxu0  ;;  %v2164_v35 = vpop.f32.mrf.mxu1 }
 0x622   : > { %2202 = vst.msk [vmem:[#allocation4 + $0x38] sm:$0xff] %vm636_vm2, %v2186_v62  ;;  %2209 = vst.msk [vmem:[#allocation4 + $0x70] sm:$0xff] %vm636_vm2, %v2193_v29  ;;  %v2184_v45 = vadd.f32 %v2135_v18, %v1999_v5  ;;  %v2191_v34 = vadd.f32 %v2164_v35, %v2006_v3 }
 0x623   : > { %v2858_v6 = vpop.f32.mrf.mxu1 }
 0x624   : > { %2200 = vst.msk [vmem:[#allocation4 + $0x28] sm:$0xff] %vm636_vm2, %v2184_v45  ;;  %2207 = vst.msk [vmem:[#allocation4 + $0x60] sm:$0xff] %vm636_vm2, %v2191_v34  ;;  %v2194_v52 = vadd.f32 %v2858_v6, %v2009_v23 }
 0x625   : > { %v2167_v7 = vpop.f32.mrf.mxu1 }
 0x626   : > { %2210 = vst.msk [vmem:[#allocation4 + $0x78] sm:$0xff] %vm636_vm2, %v2194_v52  ;;  %v2192_v41 = vadd.f32 %v2167_v7, %v2007_v38 }
 0x628   : > { %2208 = vst.msk [vmem:[#allocation4 + $0x68] sm:$0xff] %vm636_vm2, %v2192_v41 }
 0x629 PF: > { %p2696_p9 = scmp.ne.s32.totalorder %s3345_s8, 1 }
 0x62a   : > { %s3386_s8 = smov (!%p2696_p9), 64  }
 0x62b   : > { %2230 = sbr.rel (%p2696_p9) target bundleno = 1859 (0x743), region = 56 }
 0x630   : > { %v2241_v20 = vld [vmem:[#allocation3 + $0x50] sm:$0xff]  ;;  %v2239_v15 = vld [vmem:[#allocation3 + $0x40] sm:$0xff]  ;;  %v2242_v48 = vld [vmem:[#allocation3 + $0x58] sm:$0xff]  ;;  %v3385_v11 = vmov 0   ;;  %vm2395_vm2 = vcmask 523264  }
 0x631   : > { %3194 = vset.pattern.permute.xlu1 %v3385_v11  ;;  %3193 = vset.pattern.permute.xlu0 %v3385_v11  ;;  %3195 = vrcp.f32 %v2241_v20  ;;  %v2240_v42 = vld [vmem:[#allocation3 + $0x48] sm:$0xff]  ;;  %v2243_v44 = vld [vmem:[#allocation3 + $0x60] sm:$0xff]  ;;  %v2246_v57 = vld [vmem:[#allocation3 + $0x78] sm:$0xff] }
 0x632   : > { %3197 = vrcp.f32 %v2239_v15  ;;  %v2244_v58 = vld [vmem:[#allocation3 + $0x68] sm:$0xff]  ;;  %v2245_v63 = vld [vmem:[#allocation3 + $0x70] sm:$0xff]  ;;  %v2231_v2 = vld [vmem:[#allocation3] sm:$0xff] }
 0x633   : > { %3199 = vrcp.f32 %v2242_v48  ;;  %v2232_v53 = vld [vmem:[#allocation3 + $0x8] sm:$0xff]  ;;  %v2234_v16 = vld [vmem:[#allocation3 + $0x18] sm:$0xff]  ;;  %v2233_v61 = vld [vmem:[#allocation3 + $0x10] sm:$0xff] }
 0x634   : > { %3201 = vrcp.f32 %v2240_v42  ;;  %v2236_v46 = vld [vmem:[#allocation3 + $0x28] sm:$0xff]  ;;  %v2235_v43 = vld [vmem:[#allocation3 + $0x20] sm:$0xff]  ;;  %v2238_v54 = vld [vmem:[#allocation3 + $0x38] sm:$0xff] }
 0x635   : > { %3203 = vrcp.f32 %v2244_v58  ;;  %v2237_v0 = vld [vmem:[#allocation3 + $0x30] sm:$0xff]  ;;  %v2274_v4 = vld [vmem:[#allocation4 + $0x58] sm:$0xff]  ;;  %v2271_v24 = vld [vmem:[#allocation4 + $0x40] sm:$0xff] }
 0x636   : > { %3205 = vrcp.f32 %v2243_v44  ;;  %v2273_v25 = vld [vmem:[#allocation4 + $0x50] sm:$0xff]  ;;  %v2272_v50 = vld [vmem:[#allocation4 + $0x48] sm:$0xff]  ;;  %v2275_v56 = vld [vmem:[#allocation4 + $0x60] sm:$0xff] }
 0x637   : > { %3207 = vrcp.f32 %v2246_v57  ;;  %v2276_v8 = vld [vmem:[#allocation4 + $0x68] sm:$0xff]  ;;  %v2278_v60 = vld [vmem:[#allocation4 + $0x78] sm:$0xff]  ;;  %v2277_v18 = vld [vmem:[#allocation4 + $0x70] sm:$0xff] }
 0x638   : > { %3209 = vrcp.f32 %v2245_v63  ;;  %v2266_v11 = vld [vmem:[#allocation4 + $0x18] sm:$0xff]  ;;  %v2265_v42 = vld [vmem:[#allocation4 + $0x10] sm:$0xff]  ;;  %v2264_v58 = vld [vmem:[#allocation4 + $0x8] sm:$0xff] }
 0x639   : > { %3211 = vrcp.f32 %v2232_v53  ;;  %v2263_v44 = vld [vmem:[#allocation4] sm:$0xff] }
 0x63a   : > { %3213 = vrcp.f32 %v2231_v2 }
 0x63b   : > { %3215 = vrcp.f32 %v2234_v16 }
 0x63c   : > { %3217 = vrcp.f32 %v2233_v61 }
 0x63d   : > { %3219 = vrcp.f32 %v2236_v46 }
 0x63e   : > { %v3196_v21 = vpop.eup %3195  ;;  %3221 = vrcp.f32 %v2235_v43  ;;  %v2270_v43 = vld [vmem:[#allocation4 + $0x38] sm:$0xff] }
 0x63f   : > { %v3198_v17 = vpop.eup %3197  ;;  %2331 = vperm.xlu1 %3194, %v3196_v21   ;;  %3223 = vrcp.f32 %v2238_v54 }
 0x640   : > { %v3200_v22 = vpop.eup %3199  ;;  %2321 = vperm.xlu0 %3193, %v3198_v17   ;;  %3225 = vrcp.f32 %v2237_v0  ;;  %v2268_v17 = vld [vmem:[#allocation4 + $0x28] sm:$0xff] }
 0x641   : > { %v3202_v32 = vpop.eup %3201 }
 0x642   : > { %v3204_v13 = vpop.eup %3203 }
 0x643   : > { %2336 = vperm.xlu1 %3194, %v3200_v22   ;;  %v3206_v9 = vpop.eup %3205  ;;  %v2267_v22 = vld [vmem:[#allocation4 + $0x20] sm:$0xff] }
 0x644   : > { %2326 = vperm.xlu0 %3193, %v3202_v32   ;;  %v3208_v49 = vpop.eup %3207 }
 0x645   : > { %v3210_v28 = vpop.eup %3209 }
 0x646   : > { %v3212_v55 = vpop.eup %3211 }
 0x647   : > { %2346 = vperm.xlu1 %3194, %v3204_v13   ;;  %v3214_v36 = vpop.eup %3213 }
 0x648   : > { %2341 = vperm.xlu0 %3193, %v3206_v9   ;;  %v3216_v40 = vpop.eup %3215 }
 0x649   : > { %v3218_v37 = vpop.eup %3217 }
 0x64a   : > { %v3220_v1 = vpop.eup %3219 }
 0x64b   : > { %2356 = vperm.xlu1 %3194, %v3208_v49   ;;  %v3222_v59 = vpop.eup %3221  ;;  %v2269_v49 = vld [vmem:[#allocation4 + $0x30] sm:$0xff] }
 0x64c   : > { %2351 = vperm.xlu0 %3193, %v3210_v28   ;;  %v3224_v31 = vpop.eup %3223 }
 0x64d   : > { %v3226_v30 = vpop.eup %3225 }
 0x64f   : > { %2286 = vperm.xlu1 %3194, %v3212_v55  }
 0x650   : > { %2281 = vperm.xlu0 %3193, %v3214_v36  }
 0x653   : > { %2296 = vperm.xlu1 %3194, %v3216_v40  }
 0x654   : > { %2291 = vperm.xlu0 %3193, %v3218_v37  }
 0x657   : > { %2306 = vperm.xlu1 %3194, %v3220_v1  }
 0x658   : > { %2301 = vperm.xlu0 %3193, %v3222_v59  }
 0x65b   : > { %2316 = vperm.xlu1 %3194, %v3224_v31  }
 0x65c   : > { %2311 = vperm.xlu0 %3193, %v3226_v30  }
 0x6ba   : > { %v2332_v12 = vpop.permute.xlu1 %2331 }
 0x6bb   : > { %v2322_v10 = vpop.permute.xlu0 %2321  ;;  %v2369_v51 = vmul.f32 %v2332_v12, %v2273_v25 }
 0x6bc   : > { %v2367_v26 = vmul.f32 %v2322_v10, %v2271_v24 }
 0x6be   : > { %v2337_v47 = vpop.permute.xlu1 %2336 }
 0x6bf   : > { %v2370_v33 = vmul.f32 %v2337_v47, %v2274_v4  ;;  %v2327_v19 = vpop.permute.xlu0 %2326 }
 0x6c0   : > { %v2368_v27 = vmul.f32 %v2327_v19, %v2272_v50 }
 0x6c1   : > { %v2380_v14 = vpack.c.bf16 %v2370_v33, %v2369_v51 }
 0x6c2   : > { %v2379_v39 = vpack.c.bf16 %v2368_v27, %v2367_v26  ;;  %v2347_v5 = vpop.permute.xlu1 %2346 }
 0x6c3   : > { %v2372_v3 = vmul.f32 %v2347_v5, %v2276_v8  ;;  %v2342_v62 = vpop.permute.xlu0 %2341  ;;  %2389 = vrot.lane.b32.xlu1 %v2380_v14, %s3386_s8 }
 0x6c4   : > { %v2371_v29 = vmul.f32 %v2342_v62, %v2275_v56  ;;  %2387 = vrot.lane.b32.xlu0 %v2379_v39, %s3386_s8 }
 0x6c6   : > { %v2381_v35 = vpack.c.bf16 %v2372_v3, %v2371_v29  ;;  %v2357_v23 = vpop.permute.xlu1 %2356 }
 0x6c7   : > { %v2374_v45 = vmul.f32 %v2357_v23, %v2278_v60  ;;  %v2352_v34 = vpop.permute.xlu0 %2351 }
 0x6c8   : > { %v2373_v6 = vmul.f32 %v2352_v34, %v2277_v18  ;;  %2391 = vrot.lane.b32.xlu0 %v2381_v35, %s3386_s8 }
 0x6ca   : > { %v2382_v38 = vpack.c.bf16 %v2374_v45, %v2373_v6  ;;  %v2287_v52 = vpop.permute.xlu1 %2286 }
 0x6cb   : > { %v2282_v7 = vpop.permute.xlu0 %2281  ;;  %v2360_v53 = vmul.f32 %v2287_v52, %v2264_v58 }
 0x6cc   : > { %2393 = vrot.lane.b32.xlu1 %v2382_v38, %s3386_s8  ;;  %v2359_v2 = vmul.f32 %v2282_v7, %v2263_v44 }
 0x6ce   : > { %v2297_v41 = vpop.permute.xlu1 %2296  ;;  %v2375_v61 = vpack.c.bf16 %v2360_v53, %v2359_v2 }
 0x6cf   : > { %v2292_v20 = vpop.permute.xlu0 %2291  ;;  %v2362_v57 = vmul.f32 %v2297_v41, %v2266_v11 }
 0x6d0   : > { %v2361_v63 = vmul.f32 %v2292_v20, %v2265_v42 }
 0x6d2   : > { %v2307_v15 = vpop.permute.xlu1 %2306  ;;  %v2376_v32 = vpack.c.bf16 %v2362_v57, %v2361_v63 }
 0x6d3   : > { %v2302_v48 = vpop.permute.xlu0 %2301  ;;  %v2364_v13 = vmul.f32 %v2307_v15, %v2268_v17 }
 0x6d4   : > { %v2363_v46 = vmul.f32 %v2302_v48, %v2267_v22 }
 0x6d6   : > { %v2317_v21 = vpop.permute.xlu1 %2316  ;;  %v2377_v1 = vpack.c.bf16 %v2364_v13, %v2363_v46 }
 0x6d7   : > { %v2312_v16 = vpop.permute.xlu0 %2311  ;;  %v2366_v59 = vmul.f32 %v2317_v21, %v2270_v43 }
 0x6d8   : > { %v2365_v31 = vmul.f32 %v2312_v16, %v2269_v49 }
 0x6da   : > { %v2378_v4 = vpack.c.bf16 %v2366_v59, %v2365_v31 }
 0x735   : > { %v2390_v9 = vpop.permute.xlu1 %2389 }
 0x736   : > { %v2401_v54 = vsel %vm2395_vm2, %v2376_v32, %v2390_v9  ;;  %v2388_v28 = vpop.permute.xlu0 %2387 }
 0x737   : > { %v2699_v0 = vcombine.low %v2401_v54, %v2401_v54  ;;  %v2700_v55 = vcombine.high %v2401_v54, %v2401_v54  ;;  %v2398_v36 = vsel %vm2395_vm2, %v2375_v61, %v2388_v28 }
 0x738   : > { %v2697_v40 = vcombine.low %v2398_v36, %v2398_v36  ;;  %v2698_v37 = vcombine.high %v2398_v36, %v2398_v36 }
 0x739   : > { %2438 = vst [vmem:[%s3587_s23 + $0x8] sm:$0xf] %v2699_v0  ;;  %2439 = vst [vmem:[%s3587_s23 + $0xc] sm:$0xf] %v2700_v55 }
 0x73a   : > { %2436 = vst [vmem:[%s3587_s23] sm:$0xf] %v2697_v40  ;;  %2437 = vst [vmem:[%s3587_s23 + $0x4] sm:$0xf] %v2698_v37  ;;  %v2392_v30 = vpop.permute.xlu0 %2391 }
 0x73b   : > { %v2404_v12 = vsel %vm2395_vm2, %v2377_v1, %v2392_v30 }
 0x73c   : > { %v2701_v10 = vcombine.low %v2404_v12, %v2404_v12  ;;  %v2702_v25 = vcombine.high %v2404_v12, %v2404_v12 }
 0x73e   : > { %2440 = vst [vmem:[%s3587_s23 + $0x10] sm:$0xf] %v2701_v10  ;;  %2441 = vst [vmem:[%s3587_s23 + $0x14] sm:$0xf] %v2702_v25  ;;  %v2394_v24 = vpop.permute.xlu1 %2393 }
 0x73f   : > { %v2407_v50 = vsel %vm2395_vm2, %v2378_v4, %v2394_v24 }
 0x740   : > { %v2703_v47 = vcombine.low %v2407_v50, %v2407_v50  ;;  %v2704_v51 = vcombine.high %v2407_v50, %v2407_v50 }
 0x742   : > { %2442 = vst [vmem:[%s3587_s23 + $0x18] sm:$0xf] %v2703_v47  ;;  %2443 = vst [vmem:[%s3587_s23 + $0x1c] sm:$0xf] %v2704_v51 }
 0x743 PF: > { %s2457_s9 = sadd.s32 %s3353_s10, %s3535_s19  ;;  %s2708_s12 = sshll.u32 %s3357_s11, 5 }
 0x744   : > { %s2462_s24 = sshll.u32 %s3587_s23, 4  ;;  %s2459_s17 = sadd.s32 %s2708_s12, %s2457_s9  ;;  %s4459_s24 = int_to_ptr.vmem [resolvable:$true] %s2462_s24 }
 0x745   : > { %s2709_s25 = sshll.u32 %s2459_s17, 6  ;;  %s4572_s13 = sld [smem:[#allocation27_spill]] }
 0x746   : > { %s4574_s15 = sand.u32 1, %s3337_s30   ;;  %s3251_s26 = scalar_lea.vmem %s4459_s24, 512 }
 0x747   : > { %s4468_s7 = scalar_lea.sflag [#allocation9], %s4574_s15  ;;  %p3252_p10 = scmp.ne.s32.totalorder %s4459_s24, %s3251_s26 }
 0x748   : > { %s3387_s10 = smov [#allocation8]  }
 0x749   : > { %p3253_p11 = pnand %p3252_p10, %p3504_p1  ;;  %s3255_s11 = sshll.u32 %s3387_s10, 4  ;;  %s3256_s11 = int_to_ptr.vmem [resolvable:$false] %s3255_s11 }
 0x74a   : > { %s3257_s19 = scalar_lea.vmem %s3256_s11, 1024  ;;  %p3258_p13 = scmp.lt.s32.totalorder %s4459_s24, %s3256_s11 }
 0x74b   : > { %s4573_s18 = smov %s4572_s13  ;;  %s4464_s14 = scalar_lea.hbm %s4572_s13, %s2709_s25 }
 0x74c   : > { %p3254_p12 = pneg %p3253_p11  ;;  %p3259_p0 = scmp.lt.s32.totalorder %s3257_s19, %s3251_s26 }
 0x74e   : > { %p3260_p2 = por %p3259_p0, %p3258_p13 }
 0x750   : > { %p3261_p4 = pnand %p3260_p2, %p3254_p12 }
 0x752   : > { %3264 = shalt.err (!%p3261_p4)
}
 0x753   : > { %s3265_s0 = scalar_lea.hbm %s4464_s14, 512  ;;  %s3269_s1 = scalar_lea.hbm %s4573_s18, 4096 }
 0x754   : > { %p3266_p5 = scmp.ne.s32.totalorder %s4464_s14, %s3265_s0  ;;  %p3270_p8 = scmp.lt.s32.totalorder %s4464_s14, %s4573_s18 }
 0x755   : > { %p3271_p9 = scmp.lt.s32.totalorder %s3269_s1, %s3265_s0 }
 0x756   : > { %p3267_p6 = pnand %p3266_p5, %p3504_p1 }
 0x757   : > { %p3272_p10 = por %p3271_p9, %p3270_p8 }
 0x758   : > { %p3268_p7 = pneg %p3267_p6 }
 0x75a   : > { %p3273_p11 = pnand %p3272_p10, %p3268_p7 }
 0x75c   : > { %3276 = shalt.err (!%p3273_p11)
}
 0x75d   : > { %s3388_s2 = smov 64   ;;  %s3389_s5 = smov 128  }
 0x75e   : > { %s3390_s6 = smov 4  }
 0x75f   : > { %2923 = dma.vmem_to_hbm [thread:$0]  (%p3504_p1), %s4459_s24, 512, %s4464_s14, %s4468_s7, %s3388_s2, %s3389_s5, %s3390_s6  }
 0x760 PF: > { %s4575_s16 = sld [smem:[#allocation18_spill]] }
 0x761   : > { %s4576_s8 = sld [smem:[#allocation12_spill]] }
 0x766   : > { %p2929_p12 = scmp.ge.s32.totalorder %s4575_s16, 2 }
 0x767   : > { %s2477_s12 = sand.u32 1, %s4576_s8  }
 0x768   : > { %p2926_p13 = pnand %p2929_p12, %p3512_p3  ;;  %s2478_s17 = scalar_lea.sflag [#allocation9], %s2477_s12 }
 0x76a   : > { %p2927_p0 = pneg %p2926_p13 }
 0x76c   : > { %3328 = dma.done.wait (%p2927_p0), %s2478_s17, 512  }
 0x76d   : > { %3330 = vsyncadd (%p2927_p0), %s2478_s17, 4294966784  ;;  %s29_s16 = sadd.s32 1, %s4575_s16   ;;  %s4578_s25 = sld [smem:[#allocation13_spill]] }
 0x76e   : > { %p26_p2 = scmp.ge.s32.totalorder %s29_s16, 18   ;;  %s4579_s7 = sld [smem:[#allocation24_spill]] }
 0x76f   : > { %s4580_s8 = sld [smem:[#allocation14_spill]]  ;;  %s4588_s1 = smov %s3337_s30 }
 0x770   : > { %s4581_s9 = sld [smem:[#allocation15_spill]] }
 0x771   : > { %s4582_s10 = sld [smem:[#allocation16_spill]] }
 0x772   : > { %s4583_s11 = sld [smem:[#allocation17_spill]]  ;;  %28 = sbr.rel (!%p26_p2) target bundleno = 34 (0x22), region = 100 }
 0x773   : > { %s4584_s12 = sld [smem:[#allocation19_spill]]  ;;  %s4589_s30 = smov %s4578_s25 }
 0x774   : > { %s4585_s13 = sld [smem:[#allocation20_spill]] }
 0x775   : > { %s4586_s14 = sld [smem:[#allocation22_spill]] }
 0x776   : > { %s4587_s15 = sld [smem:[#allocation23_spill]] }
 0x777   :  { %2483 = vsyncpa [#allocation9], 1 }
 0x778   :  { %2485 = vsyncpa [#allocation9 + $0x1], 1 }

</bundles_post_ra>
